<compile_context>
chip_gen: v5e
topology: v5e:2x2
jax: 0.10.0
libtpu: 0.0.40
codegen_flags: <defaults>
</compile_context>

<pallas_src>
import functools
import math

import jax
import jax.numpy as jnp
from jax.experimental import pallas as pl
from jax.experimental.pallas import tpu as pltpu


# ----------------------------- config ---------------------------------------
BATCH = 2
SEQ = 8
HIDDEN = 32
NUM_HEADS = 4
HEAD_DIM = HIDDEN // NUM_HEADS
INTERMEDIATE = 64
NUM_LAYERS = 2
LN_EPS = 1e-12

# Batch elements per grid step.  1 => the "parallel" batch axis has B steps, so
# Mosaic can split them across both v7x TensorCores.  (On single-core chips a
# larger tile would amortize weight re-streaming at production dims.)
BATCH_TILE = 1

# Order in which stacked per-layer weights are passed to the kernel.
PARAM_ORDER = (
    "w_q", "b_q", "w_k", "b_k", "w_v", "b_v",
    "w_o", "b_o", "ln1_g", "ln1_b",
    "w_i", "b_i", "w_2", "b_2", "ln2_g", "ln2_b",
)


# ----------------------------- math helpers ----------------------------------
def _gelu(x):
    # TODO(synk): BERT's ACT2FN['gelu'] is the exact erf-based gelu; the tanh
    # approximation is used because erf has no Mosaic lowering rule.
    c = math.sqrt(2.0 / math.pi)
    return 0.5 * x * (1.0 + jnp.tanh(c * (x + 0.044715 * x * x * x)))


def _layer_norm(x, gamma, beta):
    # var = E[x^2] - mu^2: both reductions issue from the same input (independent
    # XLU ops) instead of serializing mean -> (x-mu)^2 -> mean.
    mu = jnp.mean(x, axis=-1, keepdims=True)
    ms = jnp.mean(x * x, axis=-1, keepdims=True)
    var = jnp.maximum(ms - mu * mu, 0.0)      # clamp cancellation noise
    return (x - mu) * jax.lax.rsqrt(var + LN_EPS) * gamma + beta


# ----------------------------- kernel ---------------------------------------
def visual_encoder_kernel(
    mask_ref, x0_ref,
    wq_ref, bq_ref, wk_ref, bk_ref, wv_ref, bv_ref,
    wo_ref, bo_ref, ln1g_ref, ln1b_ref,
    wi_ref, bi_ref, w2_ref, b2_ref, ln2g_ref, ln2b_ref,
    out_ref, h_ref,
    *, batch_tile, seq, hidden, num_heads, head_dim,
):
    """One grid step == one encoder layer over one batch tile."""
    layer = pl.program_id(1)

    # Layer 0 of this batch tile: load the input into the VMEM-resident state.
    @pl.when(layer == 0)
    def _():
        h_ref[...] = x0_ref[...].astype(jnp.float32)

    x = h_ref[...]            # (BT*S, H) f32, resident across layers
    mask = mask_ref[...]      # (BT, 1, S) additive bias

    rows = batch_tile * seq
    scale = 1.0 / math.sqrt(head_dim)

    # --- multi-head self-attention ---
    # Per-head weight slabs (static ref views, zero-cost) instead of lane-axis
    # slices of qkv; the head outputs are merged by accumulating the output
    # projection, so no lane-axis concat and no live per-head ctx tensors.
    attn = jnp.zeros((rows, hidden), jnp.float32)
    for h in range(num_heads):
        q = jnp.dot(x, wq_ref[0, h], preferred_element_type=jnp.float32) + bq_ref[0, h]
        k = jnp.dot(x, wk_ref[0, h], preferred_element_type=jnp.float32) + bk_ref[0, h]
        v = jnp.dot(x, wv_ref[0, h], preferred_element_type=jnp.float32) + bv_ref[0, h]
        q3 = q.reshape(batch_tile, seq, head_dim)
        k3 = k.reshape(batch_tile, seq, head_dim)
        v3 = v.reshape(batch_tile, seq, head_dim)

        scores = jnp.einsum("bqd,bkd->bqk", q3, k3,
                            preferred_element_type=jnp.float32) * scale + mask
        m = jnp.max(scores, axis=-1, keepdims=True)
        e = jnp.exp(scores - m)
        denom = jnp.sum(e, axis=-1, keepdims=True)
        r = pl.reciprocal(denom, approx=True)    # EUP slot (otherwise idle)
        r = r * (2.0 - denom * r)                # one Newton step -> ~f32 exact
        probs = e * r
        ctx = jnp.einsum("bqk,bkd->bqd", probs, v3,
                         preferred_element_type=jnp.float32)
        attn = attn + jnp.dot(ctx.reshape(rows, head_dim), wo_ref[0, h],
                              preferred_element_type=jnp.float32)
    attn = attn + bo_ref[0]

    # --- attention output residual + LayerNorm ---
    h1 = _layer_norm(attn + x, ln1g_ref[0], ln1b_ref[0])

    # --- FFN: intermediate (GELU) + output dense + residual + LayerNorm ---
    inter = _gelu(jnp.dot(h1, wi_ref[0], preferred_element_type=jnp.float32)
                  + bi_ref[0])
    out2 = jnp.dot(inter, w2_ref[0], preferred_element_type=jnp.float32) + b2_ref[0]
    y = _layer_norm(out2 + h1, ln2g_ref[0], ln2b_ref[0])

    # Carry state to the next layer; emit this layer's output block.  With
    # output_all_encoded_layers=False the out block index is constant along the
    # layer axis, so this store stays in VMEM and only the final layer's value
    # is written back to HBM.
    h_ref[...] = y
    out_ref[0] = y.astype(out_ref.dtype)


# ----------------------------- wrapper ---------------------------------------
def _stacked_spec(shape):
    """BlockSpec for a (L, ...) stacked weight: one layer slab per grid step."""
    n_rest = len(shape) - 1

    def idx(b, l):
        return (l,) + (0,) * n_rest

    return pl.BlockSpec((1,) + tuple(shape[1:]), idx)


def _compiler_params():
    kwargs = dict(dimension_semantics=("parallel", "arbitrary"))
    # Per-generation VMEM budget (v7x has 64 MiB physical vs 128 MiB on
    # v5e/v6e) instead of a hardcoded limit.  At toy dims any limit works; at
    # production dims additionally stream weights in bf16 and tile w_i/w_2 over
    # INTERMEDIATE so double-buffered slabs fit.
    try:
        cap = pltpu.get_tpu_info().vmem_capacity_bytes
        kwargs["vmem_limit_bytes"] = min(int(cap * 3 // 4), 96 * 1024 * 1024)
    except Exception:
        pass  # fall back to the compiler default
    return pltpu.CompilerParams(**kwargs)


def visual_encoder(hidden_states, attention_mask, stacked_params,
                   output_all_encoded_layers=True, batch_tile=BATCH_TILE):
    """VisualEncoder forward.

    hidden_states: (B, S, H)
    attention_mask: (B, 1, 1, S) additive bias (BERT convention)
    stacked_params: dict of per-layer weights stacked along a leading L axis
                    (see pack_params; linear weights stored (in, out)).
    Returns a list of per-layer outputs (all layers, or only the last one).
    """
    B, S, H = hidden_states.shape
    L = stacked_params["w_q"].shape[0]
    nh = stacked_params["w_q"].shape[1]
    hd = stacked_params["w_q"].shape[3]
    assert B % batch_tile == 0
    nb = B // batch_tile
    rows = batch_tile * S

    x0 = hidden_states.reshape(B * S, H)
    mask = attention_mask.reshape(B, 1, S)

    weight_args = [stacked_params[k] for k in PARAM_ORDER]

    in_specs = [
        pl.BlockSpec((batch_tile, 1, S), lambda b, l: (b, 0, 0)),   # mask
        # TODO(synk): x0 is only read at layer 0 but its window stays buffered
        # for the whole layer loop; at production dims replace with a one-shot
        # manual DMA (memory_space=pl.ANY) under pl.when(layer == 0).
        pl.BlockSpec((rows, H), lambda b, l: (b, 0)),               # initial state
    ] + [_stacked_spec(w.shape) for w in weight_args]

    if output_all_encoded_layers:
        out_shape = jax.ShapeDtypeStruct((L, B * S, H), hidden_states.dtype)
        out_spec = pl.BlockSpec((1, rows, H), lambda b, l: (l, b, 0))
    else:
        # Only the final layer reaches HBM: constant block index along the layer
        # axis keeps the block VMEM-resident (one writeback per batch tile).
        out_shape = jax.ShapeDtypeStruct((1, B * S, H), hidden_states.dtype)
        out_spec = pl.BlockSpec((1, rows, H), lambda b, l: (0, b, 0))

    kernel = functools.partial(
        visual_encoder_kernel,
        batch_tile=batch_tile, seq=S, hidden=H, num_heads=nh, head_dim=hd,
    )

    out = pl.pallas_call(
        kernel,
        out_shape=out_shape,
        grid_spec=pltpu.PrefetchScalarGridSpec(
            num_scalar_prefetch=0,
            grid=(nb, L),                         # (parallel batch, sequential layers)
            in_specs=in_specs,
            out_specs=out_spec,
            scratch_shapes=[pltpu.VMEM((rows, H), jnp.float32)],   # resident state
        ),
        compiler_params=_compiler_params(),
    )(mask, x0, *weight_args)

    if output_all_encoded_layers:
        out = out.reshape(L, B, S, H)
        return [out[l] for l in range(L)]
    return [out.reshape(B, S, H)]


# ----------------------------- params ---------------------------------------
def init_layer_params(key):
    """Natural (PyTorch-like) per-layer params; linear weights stored (in, out)."""
    def lin(k, fan_in, fan_out):
        bound = 1.0 / math.sqrt(fan_in)
        kw, kb = jax.random.split(k)
        w = jax.random.uniform(kw, (fan_in, fan_out), jnp.float32, -bound, bound)
        b = jax.random.uniform(kb, (fan_out,), jnp.float32, -bound, bound)
        return w, b

    ks = jax.random.split(key, 6)
    wq, bq = lin(ks[0], HIDDEN, HIDDEN)
    wk, bk = lin(ks[1], HIDDEN, HIDDEN)
    wv, bv = lin(ks[2], HIDDEN, HIDDEN)
    wo, bo = lin(ks[3], HIDDEN, HIDDEN)
    wi, bi = lin(ks[4], HIDDEN, INTERMEDIATE)
    w2, b2 = lin(ks[5], INTERMEDIATE, HIDDEN)
    ones = jnp.ones((HIDDEN,), jnp.float32)
    zeros = jnp.zeros((HIDDEN,), jnp.float32)
    return dict(wq=wq, bq=bq, wk=wk, bk=bk, wv=wv, bv=bv, wo=wo, bo=bo,
                ln1_g=ones, ln1_b=zeros, wi=wi, bi=bi, w2=w2, b2=b2,
                ln2_g=ones, ln2_b=zeros)


def pack_params(layer_params):
    """Stack per-layer params along a leading L axis, pre-split per head.

    Q/K/V weights -> (L, NH, H, HD), O weight -> (L, NH, HD, H), so the kernel
    never slices activations along the lane axis.
    """
    def per_head_in(w):        # (H, H) -> (NH, H, HD)
        return w.reshape(HIDDEN, NUM_HEADS, HEAD_DIM).transpose(1, 0, 2)

    def per_head_bias(b):      # (H,) -> (NH, 1, HD)
        return b.reshape(NUM_HEADS, 1, HEAD_DIM)

    def stack(fn, name):
        return jnp.stack([fn(p[name]) for p in layer_params])

    row = lambda n: (lambda t: t.reshape(1, n))
    return {
        "w_q": stack(per_head_in, "wq"), "b_q": stack(per_head_bias, "bq"),
        "w_k": stack(per_head_in, "wk"), "b_k": stack(per_head_bias, "bk"),
        "w_v": stack(per_head_in, "wv"), "b_v": stack(per_head_bias, "bv"),
        "w_o": stack(lambda w: w.reshape(NUM_HEADS, HEAD_DIM, HIDDEN), "wo"),
        "b_o": stack(row(HIDDEN), "bo"),
        "ln1_g": stack(row(HIDDEN), "ln1_g"), "ln1_b": stack(row(HIDDEN), "ln1_b"),
        "w_i": stack(lambda w: w, "wi"), "b_i": stack(row(INTERMEDIATE), "bi"),
        "w_2": stack(lambda w: w, "w2"), "b_2": stack(row(HIDDEN), "b2"),
        "ln2_g": stack(row(HIDDEN), "ln2_g"), "ln2_b": stack(row(HIDDEN), "ln2_b"),
    }


# ----------------------------- pure-JAX reference ----------------------------
def _ref_layer_norm(x, gamma, beta):
    mu = jnp.mean(x, axis=-1, keepdims=True)
    var = jnp.mean((x - mu) ** 2, axis=-1, keepdims=True)
    return (x - mu) * jax.lax.rsqrt(var + LN_EPS) * gamma + beta


def ref_layer(x, mask, p):
    B, S, H = x.shape
    q = x @ p["wq"] + p["bq"]
    k = x @ p["wk"] + p["bk"]
    v = x @ p["wv"] + p["bv"]

    def split(t):
        return t.reshape(B, S, NUM_HEADS, HEAD_DIM).transpose(0, 2, 1, 3)

    qh, kh, vh = split(q), split(k), split(v)
    scores = jnp.einsum("bhqd,bhkd->bhqk", qh, kh) / math.sqrt(HEAD_DIM)
    scores = scores + mask                         # (B,1,1,S) broadcast
    probs = jax.nn.softmax(scores, axis=-1)
    ctx = jnp.einsum("bhqk,bhkd->bhqd", probs, vh)
    ctx = ctx.transpose(0, 2, 1, 3).reshape(B, S, H)

    h1 = _ref_layer_norm(ctx @ p["wo"] + p["bo"] + x, p["ln1_g"], p["ln1_b"])
    inter = _gelu(h1 @ p["wi"] + p["bi"])
    return _ref_layer_norm(inter @ p["w2"] + p["b2"] + h1, p["ln2_g"], p["ln2_b"])


# ----------------------------- main ------------------------------------------
if __name__ == "__main__":
    key = jax.random.PRNGKey(0)
    k_x, k_p = jax.random.split(key)

    hidden_states = jax.random.normal(k_x, (BATCH, SEQ, HIDDEN), jnp.float32)

    # BERT-style additive mask: 0 for visible, -10000 for masked positions.
    visible = jnp.ones((BATCH, SEQ), jnp.float32).at[1, -2:].set(0.0)
    attention_mask = ((1.0 - visible) * -10000.0).reshape(BATCH, 1, 1, SEQ)

    layer_params = [init_layer_params(k) for k in jax.random.split(k_p, NUM_LAYERS)]
    stacked = pack_params(layer_params)

    outs = visual_encoder(hidden_states, attention_mask, stacked,
                          output_all_encoded_layers=True)
    outs = [jax.block_until_ready(o) for o in outs]

    # pure-JAX reference
    ref = hidden_states
    refs = []
    for p in layer_params:
        ref = ref_layer(ref, attention_mask, p)
        refs.append(ref)

    assert len(outs) == NUM_LAYERS
    for o, r in zip(outs, refs):
        assert o.shape == (BATCH, SEQ, HIDDEN)
        err = float(jnp.max(jnp.abs(o - r)))
        assert jnp.allclose(o, r, atol=1e-3, rtol=1e-3), f"max abs err {err}"

    # final-layer-only path (no per-layer HBM writeback)
    last = visual_encoder(hidden_states, attention_mask, stacked,
                          output_all_encoded_layers=False)
    last = [jax.block_until_ready(o) for o in last]
    assert len(last) == 1 and last[0].shape == (BATCH, SEQ, HIDDEN)
    assert jnp.allclose(last[0], refs[-1], atol=1e-3, rtol=1e-3)

    print("KERNEL_OK")
</pallas_src>

<mosaic_0001>
module attributes {stable_mosaic.version = 11 : i64} {
  func.func @visual_encoder_kernel(%arg0: i32, %arg1: i32, %arg2: memref<1x1x8xf32, #tpu.memory_space<vmem>>, %arg3: memref<8x32xf32, #tpu.memory_space<vmem>>, %arg4: memref<1x4x32x8xf32, #tpu.memory_space<vmem>>, %arg5: memref<1x4x1x8xf32, #tpu.memory_space<vmem>>, %arg6: memref<1x4x32x8xf32, #tpu.memory_space<vmem>>, %arg7: memref<1x4x1x8xf32, #tpu.memory_space<vmem>>, %arg8: memref<1x4x32x8xf32, #tpu.memory_space<vmem>>, %arg9: memref<1x4x1x8xf32, #tpu.memory_space<vmem>>, %arg10: memref<1x4x8x32xf32, #tpu.memory_space<vmem>>, %arg11: memref<1x1x32xf32, #tpu.memory_space<vmem>>, %arg12: memref<1x1x32xf32, #tpu.memory_space<vmem>>, %arg13: memref<1x1x32xf32, #tpu.memory_space<vmem>>, %arg14: memref<1x32x64xf32, #tpu.memory_space<vmem>>, %arg15: memref<1x1x64xf32, #tpu.memory_space<vmem>>, %arg16: memref<1x64x32xf32, #tpu.memory_space<vmem>>, %arg17: memref<1x1x32xf32, #tpu.memory_space<vmem>>, %arg18: memref<1x1x32xf32, #tpu.memory_space<vmem>>, %arg19: memref<1x1x32xf32, #tpu.memory_space<vmem>>, %arg20: memref<1x8x32xf32, #tpu.memory_space<vmem>>, %arg21: memref<8x32xf32, #tpu.memory_space<vmem>>) attributes {dimension_semantics = [#tpu.dimension_semantics<parallel>, #tpu.dimension_semantics<arbitrary>], iteration_bounds = array<i64: 2, 2>, scalar_prefetch = 0 : i64, scratch_operands = 1 : i64, tpu.core_type = #tpu.core_type<tc>, window_params = [{transform_indices = @transform_0, window_bounds = array<i64: 1, 1, 8>}, {transform_indices = @transform_1, window_bounds = array<i64: 8, 32>}, {transform_indices = @transform_2, window_bounds = array<i64: 1, 4, 32, 8>}, {transform_indices = @transform_3, window_bounds = array<i64: 1, 4, 1, 8>}, {transform_indices = @transform_4, window_bounds = array<i64: 1, 4, 32, 8>}, {transform_indices = @transform_5, window_bounds = array<i64: 1, 4, 1, 8>}, {transform_indices = @transform_6, window_bounds = array<i64: 1, 4, 32, 8>}, {transform_indices = @transform_7, window_bounds = array<i64: 1, 4, 1, 8>}, {transform_indices = @transform_8, window_bounds = array<i64: 1, 4, 8, 32>}, {transform_indices = @transform_9, window_bounds = array<i64: 1, 1, 32>}, {transform_indices = @transform_10, window_bounds = array<i64: 1, 1, 32>}, {transform_indices = @transform_11, window_bounds = array<i64: 1, 1, 32>}, {transform_indices = @transform_12, window_bounds = array<i64: 1, 32, 64>}, {transform_indices = @transform_13, window_bounds = array<i64: 1, 1, 64>}, {transform_indices = @transform_14, window_bounds = array<i64: 1, 64, 32>}, {transform_indices = @transform_15, window_bounds = array<i64: 1, 1, 32>}, {transform_indices = @transform_16, window_bounds = array<i64: 1, 1, 32>}, {transform_indices = @transform_17, window_bounds = array<i64: 1, 1, 32>}, {transform_indices = @transform_18, window_bounds = array<i64: 1, 8, 32>}]} {
    %c0_i32 = arith.constant 0 : i32
    %0 = arith.cmpi eq, %arg1, %c0_i32 : i32
    %1 = arith.extui %0 : i1 to i32
    %c0_i32_0 = arith.constant 0 : i32
    %2 = arith.cmpi ne, %1, %c0_i32_0 : i32
    scf.if %2 {
      %c0_204 = arith.constant 0 : index
      %c0_205 = arith.constant 0 : index
      %295 = vector.load %arg3[%c0_204, %c0_205] : memref<8x32xf32, #tpu.memory_space<vmem>>, vector<8x32xf32>
      %c0_206 = arith.constant 0 : index
      %c0_207 = arith.constant 0 : index
      %296 = vector.load %arg21[%c0_206, %c0_207] : memref<8x32xf32, #tpu.memory_space<vmem>>, vector<8x32xf32>
      tpu.vector_store %arg21[%c0_206, %c0_207], %295 {strides = array<i32>} : memref<8x32xf32, #tpu.memory_space<vmem>>, vector<8x32xf32>,
    } else {
    }
    %c0 = arith.constant 0 : index
    %c0_1 = arith.constant 0 : index
    %3 = vector.load %arg21[%c0, %c0_1] : memref<8x32xf32, #tpu.memory_space<vmem>>, vector<8x32xf32>
    %c0_2 = arith.constant 0 : index
    %c0_3 = arith.constant 0 : index
    %c0_4 = arith.constant 0 : index
    %4 = vector.load %arg2[%c0_2, %c0_3, %c0_4] : memref<1x1x8xf32, #tpu.memory_space<vmem>>, vector<1x1x8xf32>
    %cst = arith.constant 0.000000e+00 : f32
    %5 = vector.broadcast %cst : f32 to vector<8x32xf32>
    %c0_5 = arith.constant 0 : index
    %c0_6 = arith.constant 0 : index
    %c0_7 = arith.constant 0 : index
    %c0_8 = arith.constant 0 : index
    %6 = vector.load %arg4[%c0_5, %c0_6, %c0_7, %c0_8] : memref<1x4x32x8xf32, #tpu.memory_space<vmem>>, vector<1x1x32x8xf32>
    %7 = vector.shape_cast %6 : vector<1x1x32x8xf32> to vector<32x8xf32>
    %cst_9 = arith.constant dense<0.000000e+00> : vector<8x8xf32>
    %8 = tpu.matmul %3, %7, %cst_9 {dimension_numbers = #tpu.dot_dimension_numbers<[1], [0], [0], [1], [0, 0, 1, 1], [], []>} : vector<8x32xf32>, vector<32x8xf32>, vector<8x8xf32> -> vector<8x8xf32>
    %c0_10 = arith.constant 0 : index
    %c0_11 = arith.constant 0 : index
    %c0_12 = arith.constant 0 : index
    %c0_13 = arith.constant 0 : index
    %9 = vector.load %arg5[%c0_10, %c0_11, %c0_12, %c0_13] : memref<1x4x1x8xf32, #tpu.memory_space<vmem>>, vector<1x1x1x8xf32>
    %10 = vector.shape_cast %9 : vector<1x1x1x8xf32> to vector<1x8xf32>
    %11 = vector.broadcast %10 : vector<1x8xf32> to vector<8x8xf32>
    %12 = arith.addf %8, %11 : vector<8x8xf32>
    %c0_14 = arith.constant 0 : index
    %c0_15 = arith.constant 0 : index
    %c0_16 = arith.constant 0 : index
    %c0_17 = arith.constant 0 : index
    %13 = vector.load %arg6[%c0_14, %c0_15, %c0_16, %c0_17] : memref<1x4x32x8xf32, #tpu.memory_space<vmem>>, vector<1x1x32x8xf32>
    %14 = vector.shape_cast %13 : vector<1x1x32x8xf32> to vector<32x8xf32>
    %cst_18 = arith.constant dense<0.000000e+00> : vector<8x8xf32>
    %15 = tpu.matmul %3, %14, %cst_18 {dimension_numbers = #tpu.dot_dimension_numbers<[1], [0], [0], [1], [0, 0, 1, 1], [], []>} : vector<8x32xf32>, vector<32x8xf32>, vector<8x8xf32> -> vector<8x8xf32>
    %c0_19 = arith.constant 0 : index
    %c0_20 = arith.constant 0 : index
    %c0_21 = arith.constant 0 : index
    %c0_22 = arith.constant 0 : index
    %16 = vector.load %arg7[%c0_19, %c0_20, %c0_21, %c0_22] : memref<1x4x1x8xf32, #tpu.memory_space<vmem>>, vector<1x1x1x8xf32>
    %17 = vector.shape_cast %16 : vector<1x1x1x8xf32> to vector<1x8xf32>
    %18 = vector.broadcast %17 : vector<1x8xf32> to vector<8x8xf32>
    %19 = arith.addf %15, %18 : vector<8x8xf32>
    %c0_23 = arith.constant 0 : index
    %c0_24 = arith.constant 0 : index
    %c0_25 = arith.constant 0 : index
    %c0_26 = arith.constant 0 : index
    %20 = vector.load %arg8[%c0_23, %c0_24, %c0_25, %c0_26] : memref<1x4x32x8xf32, #tpu.memory_space<vmem>>, vector<1x1x32x8xf32>
    %21 = vector.shape_cast %20 : vector<1x1x32x8xf32> to vector<32x8xf32>
    %cst_27 = arith.constant dense<0.000000e+00> : vector<8x8xf32>
    %22 = tpu.matmul %3, %21, %cst_27 {dimension_numbers = #tpu.dot_dimension_numbers<[1], [0], [0], [1], [0, 0, 1, 1], [], []>} : vector<8x32xf32>, vector<32x8xf32>, vector<8x8xf32> -> vector<8x8xf32>
    %c0_28 = arith.constant 0 : index
    %c0_29 = arith.constant 0 : index
    %c0_30 = arith.constant 0 : index
    %c0_31 = arith.constant 0 : index
    %23 = vector.load %arg9[%c0_28, %c0_29, %c0_30, %c0_31] : memref<1x4x1x8xf32, #tpu.memory_space<vmem>>, vector<1x1x1x8xf32>
    %24 = vector.shape_cast %23 : vector<1x1x1x8xf32> to vector<1x8xf32>
    %25 = vector.broadcast %24 : vector<1x8xf32> to vector<8x8xf32>
    %26 = arith.addf %22, %25 : vector<8x8xf32>
    %27 = vector.shape_cast %12 : vector<8x8xf32> to vector<1x8x8xf32>
    %28 = vector.shape_cast %19 : vector<8x8xf32> to vector<1x8x8xf32>
    %29 = vector.shape_cast %26 : vector<8x8xf32> to vector<1x8x8xf32>
    "tpu.trace_start"() <{level = 10 : i32, message = "bqd,bkd->bqk"}> : () -> ()
    %cst_32 = arith.constant dense<0.000000e+00> : vector<1x8x8xf32>
    %30 = tpu.matmul %27, %28, %cst_32 {dimension_numbers = #tpu.dot_dimension_numbers<[2], [2], [1], [1], [0, 0, 0, 1, 1, 1], [0], [0]>} : vector<1x8x8xf32>, vector<1x8x8xf32>, vector<1x8x8xf32> -> vector<1x8x8xf32>
    "tpu.trace_stop"() : () -> ()
    %cst_33 = arith.constant 0.353553385 : f32
    %31 = vector.broadcast %cst_33 : f32 to vector<1x8x8xf32>
    %32 = arith.mulf %30, %31 : vector<1x8x8xf32>
    %33 = vector.broadcast %4 : vector<1x1x8xf32> to vector<1x8x8xf32>
    %34 = arith.addf %32, %33 : vector<1x8x8xf32>
    %cst_34 = arith.constant dense<0xFF800000> : vector<1x8xf32>
    %35 = vector.multi_reduction <maximumf>, %34, %cst_34 [2] : vector<1x8x8xf32> to vector<1x8xf32>
    %36 = vector.shape_cast %35 : vector<1x8xf32> to vector<1x8x1xf32>
    %37 = vector.broadcast %36 : vector<1x8x1xf32> to vector<1x8x8xf32>
    %38 = arith.subf %34, %37 : vector<1x8x8xf32>
    %39 = math.exp %38 : vector<1x8x8xf32>
    %cst_35 = arith.constant dense<0.000000e+00> : vector<1x8xf32>
    %40 = vector.multi_reduction <add>, %39, %cst_35 [2] : vector<1x8x8xf32> to vector<1x8xf32>
    %41 = vector.shape_cast %40 : vector<1x8xf32> to vector<1x8x1xf32>
    %42 = tpu.reciprocal %41 {approx = true} : vector<1x8x1xf32> -> vector<1x8x1xf32>
    %43 = arith.mulf %41, %42 : vector<1x8x1xf32>
    %cst_36 = arith.constant 2.000000e+00 : f32
    %44 = vector.broadcast %cst_36 : f32 to vector<1x8x1xf32>
    %45 = arith.subf %44, %43 : vector<1x8x1xf32>
    %46 = arith.mulf %42, %45 : vector<1x8x1xf32>
    %47 = vector.broadcast %46 : vector<1x8x1xf32> to vector<1x8x8xf32>
    %48 = arith.mulf %39, %47 : vector<1x8x8xf32>
    "tpu.trace_start"() <{level = 10 : i32, message = "bqk,bkd->bqd"}> : () -> ()
    %cst_37 = arith.constant dense<0.000000e+00> : vector<1x8x8xf32>
    %49 = tpu.matmul %48, %29, %cst_37 {dimension_numbers = #tpu.dot_dimension_numbers<[2], [1], [1], [2], [0, 0, 0, 1, 1, 2], [0], [0]>} : vector<1x8x8xf32>, vector<1x8x8xf32>, vector<1x8x8xf32> -> vector<1x8x8xf32>
    "tpu.trace_stop"() : () -> ()
    %50 = vector.shape_cast %49 : vector<1x8x8xf32> to vector<8x8xf32>
    %c0_38 = arith.constant 0 : index
    %c0_39 = arith.constant 0 : index
    %c0_40 = arith.constant 0 : index
    %c0_41 = arith.constant 0 : index
    %51 = vector.load %arg10[%c0_38, %c0_39, %c0_40, %c0_41] : memref<1x4x8x32xf32, #tpu.memory_space<vmem>>, vector<1x1x8x32xf32>
    %52 = vector.shape_cast %51 : vector<1x1x8x32xf32> to vector<8x32xf32>
    %cst_42 = arith.constant dense<0.000000e+00> : vector<8x32xf32>
    %53 = tpu.matmul %50, %52, %cst_42 {dimension_numbers = #tpu.dot_dimension_numbers<[1], [0], [0], [1], [0, 0, 1, 1], [], []>} : vector<8x8xf32>, vector<8x32xf32>, vector<8x32xf32> -> vector<8x32xf32>
    %54 = arith.addf %5, %53 : vector<8x32xf32>
    %c0_43 = arith.constant 0 : index
    %c1 = arith.constant 1 : index
    %c0_44 = arith.constant 0 : index
    %c0_45 = arith.constant 0 : index
    %55 = vector.load %arg4[%c0_43, %c1, %c0_44, %c0_45] : memref<1x4x32x8xf32, #tpu.memory_space<vmem>>, vector<1x1x32x8xf32>
    %56 = vector.shape_cast %55 : vector<1x1x32x8xf32> to vector<32x8xf32>
    %cst_46 = arith.constant dense<0.000000e+00> : vector<8x8xf32>
    %57 = tpu.matmul %3, %56, %cst_46 {dimension_numbers = #tpu.dot_dimension_numbers<[1], [0], [0], [1], [0, 0, 1, 1], [], []>} : vector<8x32xf32>, vector<32x8xf32>, vector<8x8xf32> -> vector<8x8xf32>
    %c0_47 = arith.constant 0 : index
    %c1_48 = arith.constant 1 : index
    %c0_49 = arith.constant 0 : index
    %c0_50 = arith.constant 0 : index
    %58 = vector.load %arg5[%c0_47, %c1_48, %c0_49, %c0_50] : memref<1x4x1x8xf32, #tpu.memory_space<vmem>>, vector<1x1x1x8xf32>
    %59 = vector.shape_cast %58 : vector<1x1x1x8xf32> to vector<1x8xf32>
    %60 = vector.broadcast %59 : vector<1x8xf32> to vector<8x8xf32>
    %61 = arith.addf %57, %60 : vector<8x8xf32>
    %c0_51 = arith.constant 0 : index
    %c1_52 = arith.constant 1 : index
    %c0_53 = arith.constant 0 : index
    %c0_54 = arith.constant 0 : index
    %62 = vector.load %arg6[%c0_51, %c1_52, %c0_53, %c0_54] : memref<1x4x32x8xf32, #tpu.memory_space<vmem>>, vector<1x1x32x8xf32>
    %63 = vector.shape_cast %62 : vector<1x1x32x8xf32> to vector<32x8xf32>
    %cst_55 = arith.constant dense<0.000000e+00> : vector<8x8xf32>
    %64 = tpu.matmul %3, %63, %cst_55 {dimension_numbers = #tpu.dot_dimension_numbers<[1], [0], [0], [1], [0, 0, 1, 1], [], []>} : vector<8x32xf32>, vector<32x8xf32>, vector<8x8xf32> -> vector<8x8xf32>
    %c0_56 = arith.constant 0 : index
    %c1_57 = arith.constant 1 : index
    %c0_58 = arith.constant 0 : index
    %c0_59 = arith.constant 0 : index
    %65 = vector.load %arg7[%c0_56, %c1_57, %c0_58, %c0_59] : memref<1x4x1x8xf32, #tpu.memory_space<vmem>>, vector<1x1x1x8xf32>
    %66 = vector.shape_cast %65 : vector<1x1x1x8xf32> to vector<1x8xf32>
    %67 = vector.broadcast %66 : vector<1x8xf32> to vector<8x8xf32>
    %68 = arith.addf %64, %67 : vector<8x8xf32>
    %c0_60 = arith.constant 0 : index
    %c1_61 = arith.constant 1 : index
    %c0_62 = arith.constant 0 : index
    %c0_63 = arith.constant 0 : index
    %69 = vector.load %arg8[%c0_60, %c1_61, %c0_62, %c0_63] : memref<1x4x32x8xf32, #tpu.memory_space<vmem>>, vector<1x1x32x8xf32>
    %70 = vector.shape_cast %69 : vector<1x1x32x8xf32> to vector<32x8xf32>
    %cst_64 = arith.constant dense<0.000000e+00> : vector<8x8xf32>
    %71 = tpu.matmul %3, %70, %cst_64 {dimension_numbers = #tpu.dot_dimension_numbers<[1], [0], [0], [1], [0, 0, 1, 1], [], []>} : vector<8x32xf32>, vector<32x8xf32>, vector<8x8xf32> -> vector<8x8xf32>
    %c0_65 = arith.constant 0 : index
    %c1_66 = arith.constant 1 : index
    %c0_67 = arith.constant 0 : index
    %c0_68 = arith.constant 0 : index
    %72 = vector.load %arg9[%c0_65, %c1_66, %c0_67, %c0_68] : memref<1x4x1x8xf32, #tpu.memory_space<vmem>>, vector<1x1x1x8xf32>
    %73 = vector.shape_cast %72 : vector<1x1x1x8xf32> to vector<1x8xf32>
    %74 = vector.broadcast %73 : vector<1x8xf32> to vector<8x8xf32>
    %75 = arith.addf %71, %74 : vector<8x8xf32>
    %76 = vector.shape_cast %61 : vector<8x8xf32> to vector<1x8x8xf32>
    %77 = vector.shape_cast %68 : vector<8x8xf32> to vector<1x8x8xf32>
    %78 = vector.shape_cast %75 : vector<8x8xf32> to vector<1x8x8xf32>
    "tpu.trace_start"() <{level = 10 : i32, message = "bqd,bkd->bqk"}> : () -> ()
    %cst_69 = arith.constant dense<0.000000e+00> : vector<1x8x8xf32>
    %79 = tpu.matmul %76, %77, %cst_69 {dimension_numbers = #tpu.dot_dimension_numbers<[2], [2], [1], [1], [0, 0, 0, 1, 1, 1], [0], [0]>} : vector<1x8x8xf32>, vector<1x8x8xf32>, vector<1x8x8xf32> -> vector<1x8x8xf32>
    "tpu.trace_stop"() : () -> ()
    %cst_70 = arith.constant 0.353553385 : f32
    %80 = vector.broadcast %cst_70 : f32 to vector<1x8x8xf32>
    %81 = arith.mulf %79, %80 : vector<1x8x8xf32>
    %82 = vector.broadcast %4 : vector<1x1x8xf32> to vector<1x8x8xf32>
    %83 = arith.addf %81, %82 : vector<1x8x8xf32>
    %cst_71 = arith.constant dense<0xFF800000> : vector<1x8xf32>
    %84 = vector.multi_reduction <maximumf>, %83, %cst_71 [2] : vector<1x8x8xf32> to vector<1x8xf32>
    %85 = vector.shape_cast %84 : vector<1x8xf32> to vector<1x8x1xf32>
    %86 = vector.broadcast %85 : vector<1x8x1xf32> to vector<1x8x8xf32>
    %87 = arith.subf %83, %86 : vector<1x8x8xf32>
    %88 = math.exp %87 : vector<1x8x8xf32>
    %cst_72 = arith.constant dense<0.000000e+00> : vector<1x8xf32>
    %89 = vector.multi_reduction <add>, %88, %cst_72 [2] : vector<1x8x8xf32> to vector<1x8xf32>
    %90 = vector.shape_cast %89 : vector<1x8xf32> to vector<1x8x1xf32>
    %91 = tpu.reciprocal %90 {approx = true} : vector<1x8x1xf32> -> vector<1x8x1xf32>
    %92 = arith.mulf %90, %91 : vector<1x8x1xf32>
    %cst_73 = arith.constant 2.000000e+00 : f32
    %93 = vector.broadcast %cst_73 : f32 to vector<1x8x1xf32>
    %94 = arith.subf %93, %92 : vector<1x8x1xf32>
    %95 = arith.mulf %91, %94 : vector<1x8x1xf32>
    %96 = vector.broadcast %95 : vector<1x8x1xf32> to vector<1x8x8xf32>
    %97 = arith.mulf %88, %96 : vector<1x8x8xf32>
    "tpu.trace_start"() <{level = 10 : i32, message = "bqk,bkd->bqd"}> : () -> ()
    %cst_74 = arith.constant dense<0.000000e+00> : vector<1x8x8xf32>
    %98 = tpu.matmul %97, %78, %cst_74 {dimension_numbers = #tpu.dot_dimension_numbers<[2], [1], [1], [2], [0, 0, 0, 1, 1, 2], [0], [0]>} : vector<1x8x8xf32>, vector<1x8x8xf32>, vector<1x8x8xf32> -> vector<1x8x8xf32>
    "tpu.trace_stop"() : () -> ()
    %99 = vector.shape_cast %98 : vector<1x8x8xf32> to vector<8x8xf32>
    %c0_75 = arith.constant 0 : index
    %c1_76 = arith.constant 1 : index
    %c0_77 = arith.constant 0 : index
    %c0_78 = arith.constant 0 : index
    %100 = vector.load %arg10[%c0_75, %c1_76, %c0_77, %c0_78] : memref<1x4x8x32xf32, #tpu.memory_space<vmem>>, vector<1x1x8x32xf32>
    %101 = vector.shape_cast %100 : vector<1x1x8x32xf32> to vector<8x32xf32>
    %cst_79 = arith.constant dense<0.000000e+00> : vector<8x32xf32>
    %102 = tpu.matmul %99, %101, %cst_79 {dimension_numbers = #tpu.dot_dimension_numbers<[1], [0], [0], [1], [0, 0, 1, 1], [], []>} : vector<8x8xf32>, vector<8x32xf32>, vector<8x32xf32> -> vector<8x32xf32>
    %103 = arith.addf %54, %102 : vector<8x32xf32>
    %c0_80 = arith.constant 0 : index
    %c2 = arith.constant 2 : index
    %c0_81 = arith.constant 0 : index
    %c0_82 = arith.constant 0 : index
    %104 = vector.load %arg4[%c0_80, %c2, %c0_81, %c0_82] : memref<1x4x32x8xf32, #tpu.memory_space<vmem>>, vector<1x1x32x8xf32>
    %105 = vector.shape_cast %104 : vector<1x1x32x8xf32> to vector<32x8xf32>
    %cst_83 = arith.constant dense<0.000000e+00> : vector<8x8xf32>
    %106 = tpu.matmul %3, %105, %cst_83 {dimension_numbers = #tpu.dot_dimension_numbers<[1], [0], [0], [1], [0, 0, 1, 1], [], []>} : vector<8x32xf32>, vector<32x8xf32>, vector<8x8xf32> -> vector<8x8xf32>
    %c0_84 = arith.constant 0 : index
    %c2_85 = arith.constant 2 : index
    %c0_86 = arith.constant 0 : index
    %c0_87 = arith.constant 0 : index
    %107 = vector.load %arg5[%c0_84, %c2_85, %c0_86, %c0_87] : memref<1x4x1x8xf32, #tpu.memory_space<vmem>>, vector<1x1x1x8xf32>
    %108 = vector.shape_cast %107 : vector<1x1x1x8xf32> to vector<1x8xf32>
    %109 = vector.broadcast %108 : vector<1x8xf32> to vector<8x8xf32>
    %110 = arith.addf %106, %109 : vector<8x8xf32>
    %c0_88 = arith.constant 0 : index
    %c2_89 = arith.constant 2 : index
    %c0_90 = arith.constant 0 : index
    %c0_91 = arith.constant 0 : index
    %111 = vector.load %arg6[%c0_88, %c2_89, %c0_90, %c0_91] : memref<1x4x32x8xf32, #tpu.memory_space<vmem>>, vector<1x1x32x8xf32>
    %112 = vector.shape_cast %111 : vector<1x1x32x8xf32> to vector<32x8xf32>
    %cst_92 = arith.constant dense<0.000000e+00> : vector<8x8xf32>
    %113 = tpu.matmul %3, %112, %cst_92 {dimension_numbers = #tpu.dot_dimension_numbers<[1], [0], [0], [1], [0, 0, 1, 1], [], []>} : vector<8x32xf32>, vector<32x8xf32>, vector<8x8xf32> -> vector<8x8xf32>
    %c0_93 = arith.constant 0 : index
    %c2_94 = arith.constant 2 : index
    %c0_95 = arith.constant 0 : index
    %c0_96 = arith.constant 0 : index
    %114 = vector.load %arg7[%c0_93, %c2_94, %c0_95, %c0_96] : memref<1x4x1x8xf32, #tpu.memory_space<vmem>>, vector<1x1x1x8xf32>
    %115 = vector.shape_cast %114 : vector<1x1x1x8xf32> to vector<1x8xf32>
    %116 = vector.broadcast %115 : vector<1x8xf32> to vector<8x8xf32>
    %117 = arith.addf %113, %116 : vector<8x8xf32>
    %c0_97 = arith.constant 0 : index
    %c2_98 = arith.constant 2 : index
    %c0_99 = arith.constant 0 : index
    %c0_100 = arith.constant 0 : index
    %118 = vector.load %arg8[%c0_97, %c2_98, %c0_99, %c0_100] : memref<1x4x32x8xf32, #tpu.memory_space<vmem>>, vector<1x1x32x8xf32>
    %119 = vector.shape_cast %118 : vector<1x1x32x8xf32> to vector<32x8xf32>
    %cst_101 = arith.constant dense<0.000000e+00> : vector<8x8xf32>
    %120 = tpu.matmul %3, %119, %cst_101 {dimension_numbers = #tpu.dot_dimension_numbers<[1], [0], [0], [1], [0, 0, 1, 1], [], []>} : vector<8x32xf32>, vector<32x8xf32>, vector<8x8xf32> -> vector<8x8xf32>
    %c0_102 = arith.constant 0 : index
    %c2_103 = arith.constant 2 : index
    %c0_104 = arith.constant 0 : index
    %c0_105 = arith.constant 0 : index
    %121 = vector.load %arg9[%c0_102, %c2_103, %c0_104, %c0_105] : memref<1x4x1x8xf32, #tpu.memory_space<vmem>>, vector<1x1x1x8xf32>
    %122 = vector.shape_cast %121 : vector<1x1x1x8xf32> to vector<1x8xf32>
    %123 = vector.broadcast %122 : vector<1x8xf32> to vector<8x8xf32>
    %124 = arith.addf %120, %123 : vector<8x8xf32>
    %125 = vector.shape_cast %110 : vector<8x8xf32> to vector<1x8x8xf32>
    %126 = vector.shape_cast %117 : vector<8x8xf32> to vector<1x8x8xf32>
    %127 = vector.shape_cast %124 : vector<8x8xf32> to vector<1x8x8xf32>
    "tpu.trace_start"() <{level = 10 : i32, message = "bqd,bkd->bqk"}> : () -> ()
    %cst_106 = arith.constant dense<0.000000e+00> : vector<1x8x8xf32>
    %128 = tpu.matmul %125, %126, %cst_106 {dimension_numbers = #tpu.dot_dimension_numbers<[2], [2], [1], [1], [0, 0, 0, 1, 1, 1], [0], [0]>} : vector<1x8x8xf32>, vector<1x8x8xf32>, vector<1x8x8xf32> -> vector<1x8x8xf32>
    "tpu.trace_stop"() : () -> ()
    %cst_107 = arith.constant 0.353553385 : f32
    %129 = vector.broadcast %cst_107 : f32 to vector<1x8x8xf32>
    %130 = arith.mulf %128, %129 : vector<1x8x8xf32>
    %131 = vector.broadcast %4 : vector<1x1x8xf32> to vector<1x8x8xf32>
    %132 = arith.addf %130, %131 : vector<1x8x8xf32>
    %cst_108 = arith.constant dense<0xFF800000> : vector<1x8xf32>
    %133 = vector.multi_reduction <maximumf>, %132, %cst_108 [2] : vector<1x8x8xf32> to vector<1x8xf32>
    %134 = vector.shape_cast %133 : vector<1x8xf32> to vector<1x8x1xf32>
    %135 = vector.broadcast %134 : vector<1x8x1xf32> to vector<1x8x8xf32>
    %136 = arith.subf %132, %135 : vector<1x8x8xf32>
    %137 = math.exp %136 : vector<1x8x8xf32>
    %cst_109 = arith.constant dense<0.000000e+00> : vector<1x8xf32>
    %138 = vector.multi_reduction <add>, %137, %cst_109 [2] : vector<1x8x8xf32> to vector<1x8xf32>
    %139 = vector.shape_cast %138 : vector<1x8xf32> to vector<1x8x1xf32>
    %140 = tpu.reciprocal %139 {approx = true} : vector<1x8x1xf32> -> vector<1x8x1xf32>
    %141 = arith.mulf %139, %140 : vector<1x8x1xf32>
    %cst_110 = arith.constant 2.000000e+00 : f32
    %142 = vector.broadcast %cst_110 : f32 to vector<1x8x1xf32>
    %143 = arith.subf %142, %141 : vector<1x8x1xf32>
    %144 = arith.mulf %140, %143 : vector<1x8x1xf32>
    %145 = vector.broadcast %144 : vector<1x8x1xf32> to vector<1x8x8xf32>
    %146 = arith.mulf %137, %145 : vector<1x8x8xf32>
    "tpu.trace_start"() <{level = 10 : i32, message = "bqk,bkd->bqd"}> : () -> ()
    %cst_111 = arith.constant dense<0.000000e+00> : vector<1x8x8xf32>
    %147 = tpu.matmul %146, %127, %cst_111 {dimension_numbers = #tpu.dot_dimension_numbers<[2], [1], [1], [2], [0, 0, 0, 1, 1, 2], [0], [0]>} : vector<1x8x8xf32>, vector<1x8x8xf32>, vector<1x8x8xf32> -> vector<1x8x8xf32>
    "tpu.trace_stop"() : () -> ()
    %148 = vector.shape_cast %147 : vector<1x8x8xf32> to vector<8x8xf32>
    %c0_112 = arith.constant 0 : index
    %c2_113 = arith.constant 2 : index
    %c0_114 = arith.constant 0 : index
    %c0_115 = arith.constant 0 : index
    %149 = vector.load %arg10[%c0_112, %c2_113, %c0_114, %c0_115] : memref<1x4x8x32xf32, #tpu.memory_space<vmem>>, vector<1x1x8x32xf32>
    %150 = vector.shape_cast %149 : vector<1x1x8x32xf32> to vector<8x32xf32>
    %cst_116 = arith.constant dense<0.000000e+00> : vector<8x32xf32>
    %151 = tpu.matmul %148, %150, %cst_116 {dimension_numbers = #tpu.dot_dimension_numbers<[1], [0], [0], [1], [0, 0, 1, 1], [], []>} : vector<8x8xf32>, vector<8x32xf32>, vector<8x32xf32> -> vector<8x32xf32>
    %152 = arith.addf %103, %151 : vector<8x32xf32>
    %c0_117 = arith.constant 0 : index
    %c3 = arith.constant 3 : index
    %c0_118 = arith.constant 0 : index
    %c0_119 = arith.constant 0 : index
    %153 = vector.load %arg4[%c0_117, %c3, %c0_118, %c0_119] : memref<1x4x32x8xf32, #tpu.memory_space<vmem>>, vector<1x1x32x8xf32>
    %154 = vector.shape_cast %153 : vector<1x1x32x8xf32> to vector<32x8xf32>
    %cst_120 = arith.constant dense<0.000000e+00> : vector<8x8xf32>
    %155 = tpu.matmul %3, %154, %cst_120 {dimension_numbers = #tpu.dot_dimension_numbers<[1], [0], [0], [1], [0, 0, 1, 1], [], []>} : vector<8x32xf32>, vector<32x8xf32>, vector<8x8xf32> -> vector<8x8xf32>
    %c0_121 = arith.constant 0 : index
    %c3_122 = arith.constant 3 : index
    %c0_123 = arith.constant 0 : index
    %c0_124 = arith.constant 0 : index
    %156 = vector.load %arg5[%c0_121, %c3_122, %c0_123, %c0_124] : memref<1x4x1x8xf32, #tpu.memory_space<vmem>>, vector<1x1x1x8xf32>
    %157 = vector.shape_cast %156 : vector<1x1x1x8xf32> to vector<1x8xf32>
    %158 = vector.broadcast %157 : vector<1x8xf32> to vector<8x8xf32>
    %159 = arith.addf %155, %158 : vector<8x8xf32>
    %c0_125 = arith.constant 0 : index
    %c3_126 = arith.constant 3 : index
    %c0_127 = arith.constant 0 : index
    %c0_128 = arith.constant 0 : index
    %160 = vector.load %arg6[%c0_125, %c3_126, %c0_127, %c0_128] : memref<1x4x32x8xf32, #tpu.memory_space<vmem>>, vector<1x1x32x8xf32>
    %161 = vector.shape_cast %160 : vector<1x1x32x8xf32> to vector<32x8xf32>
    %cst_129 = arith.constant dense<0.000000e+00> : vector<8x8xf32>
    %162 = tpu.matmul %3, %161, %cst_129 {dimension_numbers = #tpu.dot_dimension_numbers<[1], [0], [0], [1], [0, 0, 1, 1], [], []>} : vector<8x32xf32>, vector<32x8xf32>, vector<8x8xf32> -> vector<8x8xf32>
    %c0_130 = arith.constant 0 : index
    %c3_131 = arith.constant 3 : index
    %c0_132 = arith.constant 0 : index
    %c0_133 = arith.constant 0 : index
    %163 = vector.load %arg7[%c0_130, %c3_131, %c0_132, %c0_133] : memref<1x4x1x8xf32, #tpu.memory_space<vmem>>, vector<1x1x1x8xf32>
    %164 = vector.shape_cast %163 : vector<1x1x1x8xf32> to vector<1x8xf32>
    %165 = vector.broadcast %164 : vector<1x8xf32> to vector<8x8xf32>
    %166 = arith.addf %162, %165 : vector<8x8xf32>
    %c0_134 = arith.constant 0 : index
    %c3_135 = arith.constant 3 : index
    %c0_136 = arith.constant 0 : index
    %c0_137 = arith.constant 0 : index
    %167 = vector.load %arg8[%c0_134, %c3_135, %c0_136, %c0_137] : memref<1x4x32x8xf32, #tpu.memory_space<vmem>>, vector<1x1x32x8xf32>
    %168 = vector.shape_cast %167 : vector<1x1x32x8xf32> to vector<32x8xf32>
    %cst_138 = arith.constant dense<0.000000e+00> : vector<8x8xf32>
    %169 = tpu.matmul %3, %168, %cst_138 {dimension_numbers = #tpu.dot_dimension_numbers<[1], [0], [0], [1], [0, 0, 1, 1], [], []>} : vector<8x32xf32>, vector<32x8xf32>, vector<8x8xf32> -> vector<8x8xf32>
    %c0_139 = arith.constant 0 : index
    %c3_140 = arith.constant 3 : index
    %c0_141 = arith.constant 0 : index
    %c0_142 = arith.constant 0 : index
    %170 = vector.load %arg9[%c0_139, %c3_140, %c0_141, %c0_142] : memref<1x4x1x8xf32, #tpu.memory_space<vmem>>, vector<1x1x1x8xf32>
    %171 = vector.shape_cast %170 : vector<1x1x1x8xf32> to vector<1x8xf32>
    %172 = vector.broadcast %171 : vector<1x8xf32> to vector<8x8xf32>
    %173 = arith.addf %169, %172 : vector<8x8xf32>
    %174 = vector.shape_cast %159 : vector<8x8xf32> to vector<1x8x8xf32>
    %175 = vector.shape_cast %166 : vector<8x8xf32> to vector<1x8x8xf32>
    %176 = vector.shape_cast %173 : vector<8x8xf32> to vector<1x8x8xf32>
    "tpu.trace_start"() <{level = 10 : i32, message = "bqd,bkd->bqk"}> : () -> ()
    %cst_143 = arith.constant dense<0.000000e+00> : vector<1x8x8xf32>
    %177 = tpu.matmul %174, %175, %cst_143 {dimension_numbers = #tpu.dot_dimension_numbers<[2], [2], [1], [1], [0, 0, 0, 1, 1, 1], [0], [0]>} : vector<1x8x8xf32>, vector<1x8x8xf32>, vector<1x8x8xf32> -> vector<1x8x8xf32>
    "tpu.trace_stop"() : () -> ()
    %cst_144 = arith.constant 0.353553385 : f32
    %178 = vector.broadcast %cst_144 : f32 to vector<1x8x8xf32>
    %179 = arith.mulf %177, %178 : vector<1x8x8xf32>
    %180 = vector.broadcast %4 : vector<1x1x8xf32> to vector<1x8x8xf32>
    %181 = arith.addf %179, %180 : vector<1x8x8xf32>
    %cst_145 = arith.constant dense<0xFF800000> : vector<1x8xf32>
    %182 = vector.multi_reduction <maximumf>, %181, %cst_145 [2] : vector<1x8x8xf32> to vector<1x8xf32>
    %183 = vector.shape_cast %182 : vector<1x8xf32> to vector<1x8x1xf32>
    %184 = vector.broadcast %183 : vector<1x8x1xf32> to vector<1x8x8xf32>
    %185 = arith.subf %181, %184 : vector<1x8x8xf32>
    %186 = math.exp %185 : vector<1x8x8xf32>
    %cst_146 = arith.constant dense<0.000000e+00> : vector<1x8xf32>
    %187 = vector.multi_reduction <add>, %186, %cst_146 [2] : vector<1x8x8xf32> to vector<1x8xf32>
    %188 = vector.shape_cast %187 : vector<1x8xf32> to vector<1x8x1xf32>
    %189 = tpu.reciprocal %188 {approx = true} : vector<1x8x1xf32> -> vector<1x8x1xf32>
    %190 = arith.mulf %188, %189 : vector<1x8x1xf32>
    %cst_147 = arith.constant 2.000000e+00 : f32
    %191 = vector.broadcast %cst_147 : f32 to vector<1x8x1xf32>
    %192 = arith.subf %191, %190 : vector<1x8x1xf32>
    %193 = arith.mulf %189, %192 : vector<1x8x1xf32>
    %194 = vector.broadcast %193 : vector<1x8x1xf32> to vector<1x8x8xf32>
    %195 = arith.mulf %186, %194 : vector<1x8x8xf32>
    "tpu.trace_start"() <{level = 10 : i32, message = "bqk,bkd->bqd"}> : () -> ()
    %cst_148 = arith.constant dense<0.000000e+00> : vector<1x8x8xf32>
    %196 = tpu.matmul %195, %176, %cst_148 {dimension_numbers = #tpu.dot_dimension_numbers<[2], [1], [1], [2], [0, 0, 0, 1, 1, 2], [0], [0]>} : vector<1x8x8xf32>, vector<1x8x8xf32>, vector<1x8x8xf32> -> vector<1x8x8xf32>
    "tpu.trace_stop"() : () -> ()
    %197 = vector.shape_cast %196 : vector<1x8x8xf32> to vector<8x8xf32>
    %c0_149 = arith.constant 0 : index
    %c3_150 = arith.constant 3 : index
    %c0_151 = arith.constant 0 : index
    %c0_152 = arith.constant 0 : index
    %198 = vector.load %arg10[%c0_149, %c3_150, %c0_151, %c0_152] : memref<1x4x8x32xf32, #tpu.memory_space<vmem>>, vector<1x1x8x32xf32>
    %199 = vector.shape_cast %198 : vector<1x1x8x32xf32> to vector<8x32xf32>
    %cst_153 = arith.constant dense<0.000000e+00> : vector<8x32xf32>
    %200 = tpu.matmul %197, %199, %cst_153 {dimension_numbers = #tpu.dot_dimension_numbers<[1], [0], [0], [1], [0, 0, 1, 1], [], []>} : vector<8x8xf32>, vector<8x32xf32>, vector<8x32xf32> -> vector<8x32xf32>
    %201 = arith.addf %152, %200 : vector<8x32xf32>
    %c0_154 = arith.constant 0 : index
    %c0_155 = arith.constant 0 : index
    %c0_156 = arith.constant 0 : index
    %202 = vector.load %arg11[%c0_154, %c0_155, %c0_156] : memref<1x1x32xf32, #tpu.memory_space<vmem>>, vector<1x1x32xf32>
    %203 = vector.shape_cast %202 : vector<1x1x32xf32> to vector<1x32xf32>
    %204 = vector.broadcast %203 : vector<1x32xf32> to vector<8x32xf32>
    %205 = arith.addf %201, %204 : vector<8x32xf32>
    %206 = arith.addf %205, %3 : vector<8x32xf32>
    %c0_157 = arith.constant 0 : index
    %c0_158 = arith.constant 0 : index
    %c0_159 = arith.constant 0 : index
    %207 = vector.load %arg12[%c0_157, %c0_158, %c0_159] : memref<1x1x32xf32, #tpu.memory_space<vmem>>, vector<1x1x32xf32>
    %208 = vector.shape_cast %207 : vector<1x1x32xf32> to vector<1x32xf32>
    %c0_160 = arith.constant 0 : index
    %c0_161 = arith.constant 0 : index
    %c0_162 = arith.constant 0 : index
    %209 = vector.load %arg13[%c0_160, %c0_161, %c0_162] : memref<1x1x32xf32, #tpu.memory_space<vmem>>, vector<1x1x32xf32>
    %210 = vector.shape_cast %209 : vector<1x1x32xf32> to vector<1x32xf32>
    %cst_163 = arith.constant dense<0.000000e+00> : vector<8xf32>
    %211 = vector.multi_reduction <add>, %206, %cst_163 [1] : vector<8x32xf32> to vector<8xf32>
    %212 = vector.shape_cast %211 : vector<8xf32> to vector<8x1xf32>
    %cst_164 = arith.constant 3.200000e+01 : f32
    %213 = vector.broadcast %cst_164 : f32 to vector<8x1xf32>
    %214 = arith.divf %212, %213 : vector<8x1xf32>
    %215 = arith.mulf %206, %206 : vector<8x32xf32>
    %cst_165 = arith.constant dense<0.000000e+00> : vector<8xf32>
    %216 = vector.multi_reduction <add>, %215, %cst_165 [1] : vector<8x32xf32> to vector<8xf32>
    %217 = vector.shape_cast %216 : vector<8xf32> to vector<8x1xf32>
    %cst_166 = arith.constant 3.200000e+01 : f32
    %218 = vector.broadcast %cst_166 : f32 to vector<8x1xf32>
    %219 = arith.divf %217, %218 : vector<8x1xf32>
    %220 = arith.mulf %214, %214 : vector<8x1xf32>
    %221 = arith.subf %219, %220 : vector<8x1xf32>
    %cst_167 = arith.constant 0.000000e+00 : f32
    %222 = vector.broadcast %cst_167 : f32 to vector<8x1xf32>
    %223 = arith.maximumf %221, %222 : vector<8x1xf32>
    %224 = vector.broadcast %214 : vector<8x1xf32> to vector<8x32xf32>
    %225 = arith.subf %206, %224 : vector<8x32xf32>
    %cst_168 = arith.constant 9.99999996E-13 : f32
    %226 = vector.broadcast %cst_168 : f32 to vector<8x1xf32>
    %227 = arith.addf %223, %226 : vector<8x1xf32>
    %228 = math.rsqrt %227 : vector<8x1xf32>
    %229 = vector.broadcast %228 : vector<8x1xf32> to vector<8x32xf32>
    %230 = arith.mulf %225, %229 : vector<8x32xf32>
    %231 = vector.broadcast %208 : vector<1x32xf32> to vector<8x32xf32>
    %232 = arith.mulf %230, %231 : vector<8x32xf32>
    %233 = vector.broadcast %210 : vector<1x32xf32> to vector<8x32xf32>
    %234 = arith.addf %232, %233 : vector<8x32xf32>
    %c0_169 = arith.constant 0 : index
    %c0_170 = arith.constant 0 : index
    %c0_171 = arith.constant 0 : index
    %235 = vector.load %arg14[%c0_169, %c0_170, %c0_171] : memref<1x32x64xf32, #tpu.memory_space<vmem>>, vector<1x32x64xf32>
    %236 = vector.shape_cast %235 : vector<1x32x64xf32> to vector<32x64xf32>
    %cst_172 = arith.constant dense<0.000000e+00> : vector<8x64xf32>
    %237 = tpu.matmul %234, %236, %cst_172 {dimension_numbers = #tpu.dot_dimension_numbers<[1], [0], [0], [1], [0, 0, 1, 1], [], []>} : vector<8x32xf32>, vector<32x64xf32>, vector<8x64xf32> -> vector<8x64xf32>
    %c0_173 = arith.constant 0 : index
    %c0_174 = arith.constant 0 : index
    %c0_175 = arith.constant 0 : index
    %238 = vector.load %arg15[%c0_173, %c0_174, %c0_175] : memref<1x1x64xf32, #tpu.memory_space<vmem>>, vector<1x1x64xf32>
    %239 = vector.shape_cast %238 : vector<1x1x64xf32> to vector<1x64xf32>
    %240 = vector.broadcast %239 : vector<1x64xf32> to vector<8x64xf32>
    %241 = arith.addf %237, %240 : vector<8x64xf32>
    %cst_176 = arith.constant 5.000000e-01 : f32
    %242 = vector.broadcast %cst_176 : f32 to vector<8x64xf32>
    %243 = arith.mulf %242, %241 : vector<8x64xf32>
    %cst_177 = arith.constant 4.471500e-02 : f32
    %244 = vector.broadcast %cst_177 : f32 to vector<8x64xf32>
    %245 = arith.mulf %244, %241 : vector<8x64xf32>
    %246 = arith.mulf %245, %241 : vector<8x64xf32>
    %247 = arith.mulf %246, %241 : vector<8x64xf32>
    %248 = arith.addf %241, %247 : vector<8x64xf32>
    %cst_178 = arith.constant 0.797884583 : f32
    %249 = vector.broadcast %cst_178 : f32 to vector<8x64xf32>
    %250 = arith.mulf %249, %248 : vector<8x64xf32>
    %251 = math.tanh %250 : vector<8x64xf32>
    %cst_179 = arith.constant 1.000000e+00 : f32
    %252 = vector.broadcast %cst_179 : f32 to vector<8x64xf32>
    %253 = arith.addf %252, %251 : vector<8x64xf32>
    %254 = arith.mulf %243, %253 : vector<8x64xf32>
    %c0_180 = arith.constant 0 : index
    %c0_181 = arith.constant 0 : index
    %c0_182 = arith.constant 0 : index
    %255 = vector.load %arg16[%c0_180, %c0_181, %c0_182] : memref<1x64x32xf32, #tpu.memory_space<vmem>>, vector<1x64x32xf32>
    %256 = vector.shape_cast %255 : vector<1x64x32xf32> to vector<64x32xf32>
    %cst_183 = arith.constant dense<0.000000e+00> : vector<8x32xf32>
    %257 = tpu.matmul %254, %256, %cst_183 {dimension_numbers = #tpu.dot_dimension_numbers<[1], [0], [0], [1], [0, 0, 1, 1], [], []>} : vector<8x64xf32>, vector<64x32xf32>, vector<8x32xf32> -> vector<8x32xf32>
    %c0_184 = arith.constant 0 : index
    %c0_185 = arith.constant 0 : index
    %c0_186 = arith.constant 0 : index
    %258 = vector.load %arg17[%c0_184, %c0_185, %c0_186] : memref<1x1x32xf32, #tpu.memory_space<vmem>>, vector<1x1x32xf32>
    %259 = vector.shape_cast %258 : vector<1x1x32xf32> to vector<1x32xf32>
    %260 = vector.broadcast %259 : vector<1x32xf32> to vector<8x32xf32>
    %261 = arith.addf %257, %260 : vector<8x32xf32>
    %262 = arith.addf %261, %234 : vector<8x32xf32>
    %c0_187 = arith.constant 0 : index
    %c0_188 = arith.constant 0 : index
    %c0_189 = arith.constant 0 : index
    %263 = vector.load %arg18[%c0_187, %c0_188, %c0_189] : memref<1x1x32xf32, #tpu.memory_space<vmem>>, vector<1x1x32xf32>
    %264 = vector.shape_cast %263 : vector<1x1x32xf32> to vector<1x32xf32>
    %c0_190 = arith.constant 0 : index
    %c0_191 = arith.constant 0 : index
    %c0_192 = arith.constant 0 : index
    %265 = vector.load %arg19[%c0_190, %c0_191, %c0_192] : memref<1x1x32xf32, #tpu.memory_space<vmem>>, vector<1x1x32xf32>
    %266 = vector.shape_cast %265 : vector<1x1x32xf32> to vector<1x32xf32>
    %cst_193 = arith.constant dense<0.000000e+00> : vector<8xf32>
    %267 = vector.multi_reduction <add>, %262, %cst_193 [1] : vector<8x32xf32> to vector<8xf32>
    %268 = vector.shape_cast %267 : vector<8xf32> to vector<8x1xf32>
    %cst_194 = arith.constant 3.200000e+01 : f32
    %269 = vector.broadcast %cst_194 : f32 to vector<8x1xf32>
    %270 = arith.divf %268, %269 : vector<8x1xf32>
    %271 = arith.mulf %262, %262 : vector<8x32xf32>
    %cst_195 = arith.constant dense<0.000000e+00> : vector<8xf32>
    %272 = vector.multi_reduction <add>, %271, %cst_195 [1] : vector<8x32xf32> to vector<8xf32>
    %273 = vector.shape_cast %272 : vector<8xf32> to vector<8x1xf32>
    %cst_196 = arith.constant 3.200000e+01 : f32
    %274 = vector.broadcast %cst_196 : f32 to vector<8x1xf32>
    %275 = arith.divf %273, %274 : vector<8x1xf32>
    %276 = arith.mulf %270, %270 : vector<8x1xf32>
    %277 = arith.subf %275, %276 : vector<8x1xf32>
    %cst_197 = arith.constant 0.000000e+00 : f32
    %278 = vector.broadcast %cst_197 : f32 to vector<8x1xf32>
    %279 = arith.maximumf %277, %278 : vector<8x1xf32>
    %280 = vector.broadcast %270 : vector<8x1xf32> to vector<8x32xf32>
    %281 = arith.subf %262, %280 : vector<8x32xf32>
    %cst_198 = arith.constant 9.99999996E-13 : f32
    %282 = vector.broadcast %cst_198 : f32 to vector<8x1xf32>
    %283 = arith.addf %279, %282 : vector<8x1xf32>
    %284 = math.rsqrt %283 : vector<8x1xf32>
    %285 = vector.broadcast %284 : vector<8x1xf32> to vector<8x32xf32>
    %286 = arith.mulf %281, %285 : vector<8x32xf32>
    %287 = vector.broadcast %264 : vector<1x32xf32> to vector<8x32xf32>
    %288 = arith.mulf %286, %287 : vector<8x32xf32>
    %289 = vector.broadcast %266 : vector<1x32xf32> to vector<8x32xf32>
    %290 = arith.addf %288, %289 : vector<8x32xf32>
    %c0_199 = arith.constant 0 : index
    %c0_200 = arith.constant 0 : index
    %291 = vector.load %arg21[%c0_199, %c0_200] : memref<8x32xf32, #tpu.memory_space<vmem>>, vector<8x32xf32>
    tpu.vector_store %arg21[%c0_199, %c0_200], %290 {strides = array<i32>} : memref<8x32xf32, #tpu.memory_space<vmem>>, vector<8x32xf32>,
    %c0_201 = arith.constant 0 : index
    %c0_202 = arith.constant 0 : index
    %c0_203 = arith.constant 0 : index
    %292 = vector.load %arg20[%c0_201, %c0_202, %c0_203] : memref<1x8x32xf32, #tpu.memory_space<vmem>>, vector<1x8x32xf32>
    %293 = vector.shape_cast %292 : vector<1x8x32xf32> to vector<8x32xf32>
    %294 = vector.shape_cast %290 : vector<8x32xf32> to vector<1x8x32xf32>
    tpu.vector_store %arg20[%c0_201, %c0_202, %c0_203], %294 {strides = array<i32>} : memref<1x8x32xf32, #tpu.memory_space<vmem>>, vector<1x8x32xf32>,
    return
  }
  func.func @transform_0(%arg0: i32, %arg1: i32) -> (i32, i32, i32) {
    %c0_i32 = arith.constant 0 : i32
    %c0_i32_0 = arith.constant 0 : i32
    %c0_i32_1 = arith.constant 0 : i32
    return %arg0, %c0_i32, %c0_i32_0 : i32, i32, i32
  }
  func.func @transform_1(%arg0: i32, %arg1: i32) -> (i32, i32) {
    %c0_i32 = arith.constant 0 : i32
    %c0_i32_0 = arith.constant 0 : i32
    return %arg0, %c0_i32 : i32, i32
  }
  func.func @transform_2(%arg0: i32, %arg1: i32) -> (i32, i32, i32, i32) {
    %c0_i32 = arith.constant 0 : i32
    %c0_i32_0 = arith.constant 0 : i32
    %c0_i32_1 = arith.constant 0 : i32
    %c0_i32_2 = arith.constant 0 : i32
    return %arg1, %c0_i32, %c0_i32_0, %c0_i32_1 : i32, i32, i32, i32
  }
  func.func @transform_3(%arg0: i32, %arg1: i32) -> (i32, i32, i32, i32) {
    %c0_i32 = arith.constant 0 : i32
    %c0_i32_0 = arith.constant 0 : i32
    %c0_i32_1 = arith.constant 0 : i32
    %c0_i32_2 = arith.constant 0 : i32
    return %arg1, %c0_i32, %c0_i32_0, %c0_i32_1 : i32, i32, i32, i32
  }
  func.func @transform_4(%arg0: i32, %arg1: i32) -> (i32, i32, i32, i32) {
    %c0_i32 = arith.constant 0 : i32
    %c0_i32_0 = arith.constant 0 : i32
    %c0_i32_1 = arith.constant 0 : i32
    %c0_i32_2 = arith.constant 0 : i32
    return %arg1, %c0_i32, %c0_i32_0, %c0_i32_1 : i32, i32, i32, i32
  }
  func.func @transform_5(%arg0: i32, %arg1: i32) -> (i32, i32, i32, i32) {
    %c0_i32 = arith.constant 0 : i32
    %c0_i32_0 = arith.constant 0 : i32
    %c0_i32_1 = arith.constant 0 : i32
    %c0_i32_2 = arith.constant 0 : i32
    return %arg1, %c0_i32, %c0_i32_0, %c0_i32_1 : i32, i32, i32, i32
  }
  func.func @transform_6(%arg0: i32, %arg1: i32) -> (i32, i32, i32, i32) {
    %c0_i32 = arith.constant 0 : i32
    %c0_i32_0 = arith.constant 0 : i32
    %c0_i32_1 = arith.constant 0 : i32
    %c0_i32_2 = arith.constant 0 : i32
    return %arg1, %c0_i32, %c0_i32_0, %c0_i32_1 : i32, i32, i32, i32
  }
  func.func @transform_7(%arg0: i32, %arg1: i32) -> (i32, i32, i32, i32) {
    %c0_i32 = arith.constant 0 : i32
    %c0_i32_0 = arith.constant 0 : i32
    %c0_i32_1 = arith.constant 0 : i32
    %c0_i32_2 = arith.constant 0 : i32
    return %arg1, %c0_i32, %c0_i32_0, %c0_i32_1 : i32, i32, i32, i32
  }
  func.func @transform_8(%arg0: i32, %arg1: i32) -> (i32, i32, i32, i32) {
    %c0_i32 = arith.constant 0 : i32
    %c0_i32_0 = arith.constant 0 : i32
    %c0_i32_1 = arith.constant 0 : i32
    %c0_i32_2 = arith.constant 0 : i32
    return %arg1, %c0_i32, %c0_i32_0, %c0_i32_1 : i32, i32, i32, i32
  }
  func.func @transform_9(%arg0: i32, %arg1: i32) -> (i32, i32, i32) {
    %c0_i32 = arith.constant 0 : i32
    %c0_i32_0 = arith.constant 0 : i32
    %c0_i32_1 = arith.constant 0 : i32
    return %arg1, %c0_i32, %c0_i32_0 : i32, i32, i32
  }
  func.func @transform_10(%arg0: i32, %arg1: i32) -> (i32, i32, i32) {
    %c0_i32 = arith.constant 0 : i32
    %c0_i32_0 = arith.constant 0 : i32
    %c0_i32_1 = arith.constant 0 : i32
    return %arg1, %c0_i32, %c0_i32_0 : i32, i32, i32
  }
  func.func @transform_11(%arg0: i32, %arg1: i32) -> (i32, i32, i32) {
    %c0_i32 = arith.constant 0 : i32
    %c0_i32_0 = arith.constant 0 : i32
    %c0_i32_1 = arith.constant 0 : i32
    return %arg1, %c0_i32, %c0_i32_0 : i32, i32, i32
  }
  func.func @transform_12(%arg0: i32, %arg1: i32) -> (i32, i32, i32) {
    %c0_i32 = arith.constant 0 : i32
    %c0_i32_0 = arith.constant 0 : i32
    %c0_i32_1 = arith.constant 0 : i32
    return %arg1, %c0_i32, %c0_i32_0 : i32, i32, i32
  }
  func.func @transform_13(%arg0: i32, %arg1: i32) -> (i32, i32, i32) {
    %c0_i32 = arith.constant 0 : i32
    %c0_i32_0 = arith.constant 0 : i32
    %c0_i32_1 = arith.constant 0 : i32
    return %arg1, %c0_i32, %c0_i32_0 : i32, i32, i32
  }
  func.func @transform_14(%arg0: i32, %arg1: i32) -> (i32, i32, i32) {
    %c0_i32 = arith.constant 0 : i32
    %c0_i32_0 = arith.constant 0 : i32
    %c0_i32_1 = arith.constant 0 : i32
    return %arg1, %c0_i32, %c0_i32_0 : i32, i32, i32
  }
  func.func @transform_15(%arg0: i32, %arg1: i32) -> (i32, i32, i32) {
    %c0_i32 = arith.constant 0 : i32
    %c0_i32_0 = arith.constant 0 : i32
    %c0_i32_1 = arith.constant 0 : i32
    return %arg1, %c0_i32, %c0_i32_0 : i32, i32, i32
  }
  func.func @transform_16(%arg0: i32, %arg1: i32) -> (i32, i32, i32) {
    %c0_i32 = arith.constant 0 : i32
    %c0_i32_0 = arith.constant 0 : i32
    %c0_i32_1 = arith.constant 0 : i32
    return %arg1, %c0_i32, %c0_i32_0 : i32, i32, i32
  }
  func.func @transform_17(%arg0: i32, %arg1: i32) -> (i32, i32, i32) {
    %c0_i32 = arith.constant 0 : i32
    %c0_i32_0 = arith.constant 0 : i32
    %c0_i32_1 = arith.constant 0 : i32
    return %arg1, %c0_i32, %c0_i32_0 : i32, i32, i32
  }
  func.func @transform_18(%arg0: i32, %arg1: i32) -> (i32, i32, i32) {
    %c0_i32 = arith.constant 0 : i32
    %c0_i32_0 = arith.constant 0 : i32
    return %arg1, %arg0, %c0_i32 : i32, i32, i32
  }
}

</mosaic_0001>

<bundles_post_ra>
// kernel: tpu_custom_call.1
= control target key start
LH: loop header
LB: loop body
LE: loop exit
PB: predicated region body
PF: predicated region fallthrough
CT: control target
= control target key end

     0   :  { %s2861_s0 = inlined_call_operand.vmem [shape: f32[2,1,8], index: 0, kind: input, shape index: {}]   ;;  %s2862_s1 = inlined_call_operand.vmem [shape: f32[16,32], index: 1, kind: input, shape index: {}]   ;;  %s2863_s2 = inlined_call_operand.vmem [shape: f32[2,4,32,8], index: 2, kind: input, shape index: {}]   ;;  %s2864_s3 = inlined_call_operand.vmem [shape: f32[2,4,1,8], index: 3, kind: input, shape index: {}]   ;;  %s2865_s4 = inlined_call_operand.vmem [shape: f32[2,4,32,8], index: 4, kind: input, shape index: {}]   ;;  %s2866_s5 = inlined_call_operand.vmem [shape: f32[2,4,1,8], index: 5, kind: input, shape index: {}]   ;;  %s2867_s6 = inlined_call_operand.vmem [shape: f32[2,4,32,8], index: 6, kind: input, shape index: {}]   ;;  %s2868_s7 = inlined_call_operand.vmem [shape: f32[2,4,1,8], index: 7, kind: input, shape index: {}]   ;;  %s2869_s8 = inlined_call_operand.vmem [shape: f32[2,4,8,32], index: 8, kind: input, shape index: {}]   ;;  %s2870_s9 = inlined_call_operand.vmem [shape: f32[2,1,32], index: 9, kind: input, shape index: {}]   ;;  %s2871_s10 = inlined_call_operand.vmem [shape: f32[2,1,32], index: 10, kind: input, shape index: {}]   ;;  %s2872_s11 = inlined_call_operand.vmem [shape: f32[2,1,32], index: 11, kind: input, shape index: {}]   ;;  %s2873_s12 = inlined_call_operand.vmem [shape: f32[2,32,64], index: 12, kind: input, shape index: {}]   ;;  %s2874_s13 = inlined_call_operand.vmem [shape: f32[2,1,64], index: 13, kind: input, shape index: {}]   ;;  %s2875_s14 = inlined_call_operand.vmem [shape: f32[2,64,32], index: 14, kind: input, shape index: {}]   ;;  %s2876_s15 = inlined_call_operand.vmem [shape: f32[2,1,32], index: 15, kind: input, shape index: {}]   ;;  %s2877_s16 = inlined_call_operand.vmem [shape: f32[2,1,32], index: 16, kind: input, shape index: {}]   ;;  %s2878_s17 = inlined_call_operand.vmem [shape: f32[2,1,32], index: 17, kind: input, shape index: {}]   ;;  %s2879_s18 = inlined_call_operand.hbm [shape: f32[2,16,32], index: 18, kind: output, shape index: {}]  }
   0x1   :  { %2900 = sst [smem:[#allocation23_spill]] %s2861_s0 }
   0x2   :  { %2901 = sst [smem:[#allocation24_spill]] %s2862_s1 }
   0x3   :  { %2902 = sst [smem:[#allocation25_spill]] %s2863_s2 }
   0x4   :  { %2903 = sst [smem:[#allocation26_spill]] %s2864_s3 }
   0x5   :  { %2904 = sst [smem:[#allocation27_spill]] %s2865_s4 }
   0x6   :  { %2905 = sst [smem:[#allocation28_spill]] %s2866_s5 }
   0x7   :  { %2906 = sst [smem:[#allocation29_spill]] %s2867_s6 }
   0x8   :  { %2907 = sst [smem:[#allocation30_spill]] %s2868_s7 }
   0x9   :  { %2908 = sst [smem:[#allocation31_spill]] %s2869_s8 }
   0xa   :  { %2909 = sst [smem:[#allocation32_spill]] %s2872_s11 }
   0xb   :  { %2910 = sst [smem:[#allocation33_spill]] %s2873_s12 }
   0xc   :  { %2911 = sst [smem:[#allocation34_spill]] %s2877_s16 }
   0xd   :  { %2912 = sst [smem:[#allocation35_spill]] %s2878_s17 }
   0xe   :  { %2913 = sst [smem:[#allocation36_spill]] %s2879_s18 }
   0xf   :  { %23 = vsyncpa [#allocation4], 0 }
  0x10   :  { %25 = vsyncpa [#allocation4 + $0x1], 0  ;;  %s2452_s27 = smov 0   ;;  %s2454_s28 = smov 0  }
  0x11   :  { %s2456_s29 = smov 0   ;;  %s2458_s30 = smov 0  }
  0x12   :  { %s2460_s0 = smov 0   ;;  %s2462_s19 = smov 0  }
  0x13   :  { %s2464_s1 = smov 0   ;;  %s2466_s20 = smov 0  }
  0x14 LB: > { %2914 = sst [smem:[#allocation6_spill]] %s2326_s27  ;;  %s2032_s21 = sadd.s32 4294967295, %s2354_s20   ;;  %s2354_s20 = sphi %s2466_s20, %s31_s20   ;;  %s2350_s1 = sphi %s2464_s1, %s2974_s1   ;;  %s2346_s19 = sphi %s2462_s19, %s2973_s19   ;;  %s2342_s0 = sphi %s2460_s0, %s2972_s0   ;;  %s2338_s30 = sphi %s2458_s30, %s2971_s30   ;;  %s2334_s29 = sphi %s2456_s29, %s2970_s29   ;;  %s2330_s28 = sphi %s2454_s28, %s2969_s28   ;;  %s2326_s27 = sphi %s2452_s27, %s2968_s27  }
  0x15   : > { %2915 = sst [smem:[#allocation7_spill]] %s2330_s28  ;;  %s2033_s22 = sadd.s32 4294967294, %s2354_s20  }
  0x16   : > { %2916 = sst [smem:[#allocation8_spill]] %s2334_s29  ;;  %s40_s2 = sadd.s32 1, %s2346_s19 }
  0x17   : > { %2917 = sst [smem:[#allocation9_spill]] %s2338_s30  ;;  %p41_p0 = scmp.ge.s32.totalorder %s40_s2, 2 }
  0x18   : > { %2918 = sst [smem:[#allocation10_spill]] %s2342_s0  ;;  %s43_s23 = sadd.s32 1, %s2350_s1 }
  0x19   : > { %2919 = sst [smem:[#allocation11_spill]] %s2346_s19  ;;  %p530_p1 = scmp.ne.s32.totalorder %s2334_s29, %s2330_s28 }
  0x1a   : > { %2920 = sst [smem:[#allocation12_spill]] %s2350_s1  ;;  %p531_p2 = scmp.eq.s32.totalorder %s2032_s21, 3 }
  0x1b   : > { %2921 = sst [smem:[#allocation13_spill]] %s2354_s20  ;;  %s2976_s2 = smov (%p41_p0, %s40_s2), 0 }
  0x1c   : > { %2922 = sst [smem:[#allocation14_spill]] %s2976_s2  ;;  %s2978_s23 = smov (!%p41_p0, %s43_s23), %s2350_s1 }
  0x1d   : > { %s515_s24 = ssub.s32 %s2346_s19, %s2976_s2  ;;  %p2503_p3 = por %p531_p2, %p530_p1 }
  0x1e   : > { %p45_p4 = scmp.ge.s32.totalorder %s2978_s23, 2  ;;  %p536_p5 = scmp.ne.s32.totalorder %s2330_s28, %s2326_s27 }
  0x1f   : > { %s2923_s25 = scalar_select %p2503_p3, 1, 0 }
  0x20   : > { %p537_p6 = scmp.eq.s32.totalorder %s2033_s22, 3  ;;  %p2036_p7 = scmp.ge.s32.totalorder %s2354_s20, 1 }
  0x21   : > { %2924 = sst [smem:[#allocation15_spill]] %s2923_s25  ;;  %s2980_s23 = smov (%p45_p4, %s2978_s23), 0 }
  0x22   : > { %2925 = sst [smem:[#allocation16_spill]] %s2980_s23  ;;  %p2512_p8 = por %p537_p6, %p536_p5 }
  0x23   : > { %p679_p9 = scmp.lt.s32.totalorder %s2354_s20, 5  ;;  %s516_s21 = ssub.s32 %s2350_s1, %s2980_s23 }
  0x24   : > { %s2926_s26 = scalar_select %p2512_p8, 1, 0 }
  0x25   : > { %s520_s18 = sadd.s32 1, %s2334_s29  ;;  %s517_s17 = sor.u32 %s516_s21, %s515_s24 }
  0x26   : > { %2927 = sst [smem:[#allocation17_spill]] %s2926_s26  ;;  %p680_p10 = pnand %p2036_p7, %p679_p9 }
  0x27   : > { %p518_p11 = scmp.eq.s32.totalorder %s517_s17, 0 }
  0x28   : > { %683 = sbr.rel (%p680_p10) target bundleno = 2949 (0xb85), region = 92 }
  0x29   : > { %s2521_s2 = scalar_select %p518_p11, %s2334_s29, %s520_s18  }
  0x2b   : > { %2928 = sst [smem:[#allocation18_spill]] %s2521_s2 }
  0x2d   : > { %s2885_s22 = sand.u32 1, %s2330_s28   ;;  %p798_p12 = scmp.lt.s32.totalorder %s2342_s0, 1 }
  0x2e   : > { %s2527_s19 = sshll.u32 %s2885_s22, 3  ;;  %p805_p13 = scmp.lt.s32.totalorder %s2338_s30, 1 }
  0x2f   : > { %s2531_s23 = scalar_select %p798_p12, %s2342_s0, 1 }
  0x30   : > { %s2534_s17 = scalar_select %p805_p13, %s2338_s30, 1 }
  0x31   : > { %2929 = sst [smem:[#allocation19_spill]] %s2531_s23  ;;  %s2038_s2 = sshll.u32 %s2531_s23, 3 }
  0x32   : > { %s2931_s26 = sld [smem:[#allocation24_spill]]  ;;  %s2138_s20 = sshll.u32 %s2534_s17, 7 }
  0x33   : > { %s2932_s0 = sld [smem:[#allocation25_spill]]  ;;  %s2041_s24 = sshll.u32 %s2534_s17, 2 }
  0x34   : > { %s2933_s3 = sld [smem:[#allocation26_spill]]  ;;  %s2141_s1 = sshll.u32 %s2534_s17, 5 }
  0x35   : > { %s2935_s4 = sld [smem:[#allocation27_spill]] }
  0x36   : > { %s2937_s5 = sld [smem:[#allocation28_spill]] }
  0x37   : > { %s2939_s6 = sld [smem:[#allocation29_spill]] }
  0x38   : > { %s804_s27 = scalar_lea.vmem %s2931_s26, %s2038_s2  ;;  %s2940_s7 = sld [smem:[#allocation30_spill]] }
  0x39   : > { %s2548_s18 = scalar_lea.vmem %s2932_s0, %s2138_s20  ;;  %s2941_s8 = sld [smem:[#allocation31_spill]] }
  0x3a   : > { %s2554_s21 = scalar_lea.vmem %s2933_s3, %s2041_s24  ;;  %s2943_s12 = sld [smem:[#allocation33_spill]] }
  0x3b   : > { %2934 = sst [smem:[#allocation20_spill]] %s2554_s21  ;;  %s2559_s29 = scalar_lea.vmem %s2935_s4, %s2138_s20 }
  0x3c   : > { %2936 = sst [smem:[#allocation21_spill]] %s2559_s29  ;;  %s2564_s28 = scalar_lea.vmem %s2937_s5, %s2041_s24 }
  0x3d   : > { %2938 = sst [smem:[#allocation22_spill]] %s2564_s28  ;;  %s2569_s22 = scalar_lea.vmem %s2939_s6, %s2138_s20 }
  0x3e   : > { %s2574_s3 = scalar_lea.vmem %s2940_s7, %s2041_s24  ;;  %s853_s7 = scalar_lea.vmem %s2874_s13, %s2534_s17 }
  0x3f   : > { %s2580_s21 = scalar_lea.vmem %s2941_s8, %s2141_s1  ;;  %s2143_s8 = sshll.u32 %s2534_s17, 6 }
  0x40   : > { %s2597_s6 = scalar_lea.vmem %s2943_s12, %s2141_s1  ;;  %s861_s5 = scalar_lea.vmem %s2876_s15, %s2534_s17 }
  0x41   : > { %s2611_s20 = scalar_lea.vmem %s2875_s14, %s2143_s8  ;;  %s2944_s16 = sld [smem:[#allocation34_spill]] }
  0x42   : > { %s2945_s12 = sld [smem:[#allocation35_spill]]  ;;  %s797_s4 = scalar_lea.vmem [#allocation3], %s2527_s19 }
  0x43   : > { %s2946_s23 = sld [smem:[#allocation9_spill]] }
  0x47   : > { %s864_s24 = scalar_lea.vmem %s2944_s16, %s2534_s17 }
  0x48   : > { %s867_s11 = scalar_lea.vmem %s2945_s12, %s2534_s17 }
  0x49   : > { %p2054_p0 = scmp.ne.s32.totalorder %s2946_s23, 0 }
  0x4b   : > { %871 = sbr.rel (%p2054_p0) target bundleno = 82 (0x52), region = 96 }
  0x50   : > { %v872_v0 = vld [vmem:[%s804_s27] sm:$0xff]  ;;  %vm873_vm0 = vcmask 261120  }
  0x51   : > { %874 = vst.msk [vmem:[#allocation2] sm:$0xff] %vm873_vm0, %v872_v0 }
  0x52 PF: > { %s2947_s8 = sld [smem:[#allocation21_spill]]  ;;  %v880_v1 = vld [vmem:[%s2548_s18 + $0x18] sm:$0xff]  ;;  %v879_v2 = vld [vmem:[%s2548_s18 + $0x10] sm:$0xff]  ;;  %v878_v3 = vld [vmem:[%s2548_s18 + $0x8] sm:$0xff]  ;;  %vm885_vm1 = vcmask 261120   ;;  %vm965_vm2 = vcmask 64512   ;;  %s2954_s0 = scalar_lea.vmem %s2871_s10, %s2534_s17 }
  0x53   : > { %901 = vmatpush.msra.mxu1 %v880_v1  ;;  %v877_v4 = vld [vmem:[%s2548_s18] sm:$0xff]  ;;  %s2948_s12 = sld [smem:[#allocation22_spill]]  ;;  %v940_v16 = vld [vmem:[%s2569_s22 + $0x18] sm:$0xff]  ;;  %v939_v22 = vld [vmem:[%s2569_s22 + $0x10] sm:$0xff]  ;;  %vm1700_vm7 = vcmask 523264  }
  0x54   : > { %s2949_s27 = sld [smem:[#allocation20_spill]]  ;;  %957 = vmatpush.msra.mxu2 %v940_v16  ;;  %v938_v23 = vld [vmem:[%s2569_s22 + $0x8] sm:$0xff]  ;;  %v937_v24 = vld [vmem:[%s2569_s22] sm:$0xff]  ;;  %v2064_v27 = vld [vmem:[%s2548_s18 + $0x38] sm:$0xff] }
  0x55   : > { %902 = vmatpush.msra.mxu1 %v879_v2  ;;  %s2950_s16 = sld [smem:[#allocation19_spill]]  ;;  %1057 = vmatpush.msra.mxu0 %v2064_v27  ;;  %v2063_v28 = vld [vmem:[%s2548_s18 + $0x30] sm:$0xff]  ;;  %v2062_v30 = vld [vmem:[%s2548_s18 + $0x28] sm:$0xff]  ;;  %v2061_v32 = vld [vmem:[%s2548_s18 + $0x20] sm:$0xff] }
  0x56   : > { %s2951_s29 = sld [smem:[#allocation23_spill]]  ;;  %958 = vmatpush.msra.mxu2 %v939_v22  ;;  %v2219_v38 = vld [vmem:[%s2574_s3] ss:$0 sm:$0xff]  ;;  %v2076_v44 = vld [vmem:[%s2569_s22 + $0x38] sm:$0xff]  ;;  %v2075_v45 = vld [vmem:[%s2569_s22 + $0x30] sm:$0xff] }
  0x57   : > { %903 = vmatpush.msra.mxu1 %v878_v3  ;;  %1058 = vmatpush.msra.mxu0 %v2063_v28  ;;  %v2074_v46 = vld [vmem:[%s2569_s22 + $0x28] sm:$0xff]  ;;  %v2073_v47 = vld [vmem:[%s2569_s22 + $0x20] sm:$0xff]  ;;  %s2955_s30 = sld [smem:[#allocation32_spill]] }
  0x58   : > { %v2627_v5 = vld [vmem:[#allocation2] sm:$0xff]  ;;  %v912_v6 = vld [vmem:[%s2947_s8 + $0x18] sm:$0xff]  ;;  %v911_v7 = vld [vmem:[%s2947_s8 + $0x10] sm:$0xff]  ;;  %959 = vmatpush.msra.mxu2 %v938_v23 }
  0x59   : > { %904 = vmatpush.msra.mxu1 %v877_v4  ;;  %v910_v8 = vld [vmem:[%s2947_s8 + $0x8] sm:$0xff]  ;;  %v909_v9 = vld [vmem:[%s2947_s8] sm:$0xff]  ;;  %v2070_v25 = vld [vmem:[%s2947_s8 + $0x38] sm:$0xff]  ;;  %1059 = vmatpush.msra.mxu0 %v2062_v30 }
  0x5a   : > { %2055 = vmatmul.msk.f32.vlgmr.msra.gmra.mxu1 %vm885_vm1, %v2627_v5  ;;  %v2217_v11 = vld [vmem:[%s2948_s12] ss:$0 sm:$0xff]  ;;  %960 = vmatpush.msra.mxu2 %v937_v24  ;;  %v2069_v26 = vld [vmem:[%s2947_s8 + $0x30] sm:$0xff]  ;;  %v2068_v29 = vld [vmem:[%s2947_s8 + $0x28] sm:$0xff] }
  0x5b   : > { %929 = vmatpush.msrb.mxu1 %v912_v6  ;;  %v2216_v12 = vld [vmem:[%s2949_s27] ss:$0 sm:$0xff]  ;;  %2057 = vmatmul.msk.f32.vlgmr.msra.gmra.mxu2 %vm885_vm1, %v2627_v5  ;;  %v2220_v41 = vld [vmem:[%s2948_s12 + $0x1] ss:$0 sm:$0xff]  ;;  %v2082_v23 = vld [vmem:[%s2580_s21 + $0x8] sm:$0xff] }
  0x5c   : > { %s2952_s28 = scalar_lea.vmem %s2951_s29, %s2950_s16  ;;  %v2067_v31 = vld [vmem:[%s2947_s8 + $0x20] sm:$0xff]  ;;  %1060 = vmatpush.msra.mxu0 %v2061_v32  ;;  %1117 = vmatpush.msrb.mxu2 %v2076_v44  ;;  %s2958_s16 = sld [smem:[#allocation10_spill]] }
  0x5d   : > { %930 = vmatpush.msrb.mxu1 %v911_v7  ;;  %v2647_v17 = vld [vmem:[%s2952_s28] ss:$0 sm:$0xff]  ;;  %2066 = vmatmul.msk.f32.vlgmr.msra.gmra.mxu0 %vm885_vm1, %v2627_v5  ;;  %v2221_v54 = vld [vmem:[%s2949_s27 + $0x1] ss:$0 sm:$0xff]  ;;  %s2956_s23 = scalar_lea.vmem %s2955_s30, %s2534_s17  ;;  %s2959_s29 = sld [smem:[#allocation7_spill]] }
  0x5e   : > { %1118 = vmatpush.msrb.mxu2 %v2075_v45  ;;  %v1034_v57 = vld [vmem:[%s2580_s21] sm:$0xff] }
  0x5f   : > { %931 = vmatpush.msrb.mxu1 %v910_v8  ;;  %v2222_v58 = vld [vmem:[%s2574_s3 + $0x1] ss:$0 sm:$0xff]  ;;  %v2088_v8 = vld [vmem:[%s2548_s18 + $0x58] sm:$0xff] }
  0x60   : > { %1119 = vmatpush.msrb.mxu2 %v2074_v46  ;;  %v2225_v46 = vld [vmem:[%s2574_s3 + $0x2] ss:$0 sm:$0xff] }
  0x61   : > { %932 = vmatpush.msrb.mxu1 %v909_v9  ;;  %v2087_v9 = vld [vmem:[%s2548_s18 + $0x50] sm:$0xff] }
  0x62   : > { %2056 = vmatmul.msk.f32.vlgmr.msrb.gmra.mxu1 %vm885_vm1, %v2627_v5  ;;  %1120 = vmatpush.msrb.mxu2 %v2073_v47  ;;  %v2117_v47 = vld [vmem:[%s2947_s8 + $0x78] sm:$0xff] }
  0x63   : > { %1087 = vmatpush.msra.mxu1 %v2070_v25  ;;  %2078 = vmatmul.msk.f32.vlgmr.msrb.gmra.mxu2 %vm885_vm1, %v2627_v5  ;;  %v2223_v25 = vld [vmem:[%s2948_s12 + $0x2] ss:$0 sm:$0xff] }
  0x64   : > { %1233 = vmatpush.msra.mxu2 %v1034_v57  ;;  %v2108_v57 = vld [vmem:[%s2548_s18 + $0x60] sm:$0xff] }
  0x65   : > { %1088 = vmatpush.msra.mxu1 %v2069_v26  ;;  %v2224_v26 = vld [vmem:[%s2949_s27 + $0x2] ss:$0 sm:$0xff] }
  0x67   : > { %1089 = vmatpush.msra.mxu1 %v2068_v29 }
  0x69   : > { %1090 = vmatpush.msra.mxu1 %v2067_v31 }
  0x6a   : > { %2072 = vmatmul.msk.f32.vlgmr.msra.gmra.mxu1 %vm885_vm1, %v2627_v5 }
  0x6b   : > { %1210 = vmatpush.msrb.mxu1 %v2082_v23 }
  0xd7   : > { %v906_v10 = vpop.f32.mrf.mxu1 }
  0xd8   : > { %v907_v15 = vadd.f32 %v2216_v12, %v906_v10  ;;  %v2094_v10 = vld [vmem:[%s2947_s8 + $0x58] sm:$0xff]  ;;  %v2093_v12 = vld [vmem:[%s2947_s8 + $0x50] sm:$0xff] }
  0xda   : > { %v1062_v55 = vpop.f32.mrf.mxu0 }
  0xdb   : > { %v1063_v56 = vadd.f32 %v2221_v54, %v1062_v55  ;;  %v2110_v54 = vld [vmem:[%s2548_s18 + $0x70] sm:$0xff] }
  0xdc   : > { %v2106_v55 = vld [vmem:[%s2580_s21 + $0x10] sm:$0xff] }
  0xde   : > { %v962_v39 = vpop.f32.mrf.mxu2 }
  0xdf   : > { %v934_v13 = vpop.f32.mrf.mxu1  ;;  %v963_v40 = vadd.f32 %v2219_v38, %v962_v39  ;;  %v2098_v38 = vld [vmem:[%s2569_s22 + $0x48] sm:$0xff]  ;;  %v2097_v39 = vld [vmem:[%s2569_s22 + $0x40] sm:$0xff] }
  0xe0   : > { %v935_v14 = vadd.f32 %v2217_v11, %v934_v13  ;;  %v2086_v11 = vld [vmem:[%s2548_s18 + $0x48] sm:$0xff]  ;;  %v2085_v13 = vld [vmem:[%s2548_s18 + $0x40] sm:$0xff] }
  0xe2   : > { %2058 = vmatpush.xpose.msk.msra.mxu3 %vm965_vm2, %v935_v14  ;;  %v2092_v14 = vld [vmem:[%s2947_s8 + $0x48] sm:$0xff] }
  0xe5   : > { %2059 = vmatmul.msk.f32.vlgmr.msra.gmra.mxu3 %vm965_vm2, %v907_v15  ;;  %v2091_v15 = vld [vmem:[%s2947_s8 + $0x40] sm:$0xff] }
  0xe6   : > { %1029 = vmatpush.msrb.mxu3 %v963_v40  ;;  %v1122_v59 = vpop.f32.mrf.mxu2 }
  0xe7   : > { %v1092_v42 = vpop.f32.mrf.mxu1  ;;  %v1123_v60 = vadd.f32 %v2222_v58, %v1122_v59 }
  0xe8   : > { %v1093_v43 = vadd.f32 %v2220_v41, %v1092_v42 }
  0xe9   : > { %1185 = vmatpush.msrb.mxu0 %v1123_v60 }
  0xea   : > { %2079 = vmatpush.xpose.msk.msra.mxu3 %vm965_vm2, %v1093_v43 }
  0xeb   : > { %1290 = vmatpush.msra.mxu0 %v2094_v10 }
  0xed   : > { %1291 = vmatpush.msra.mxu0 %v2093_v12 }
  0xef   : > { %1292 = vmatpush.msra.mxu0 %v2092_v14 }
  0xf1   : > { %1293 = vmatpush.msra.mxu0 %v2091_v15 }
 0x168   : > { %v989_v18 = vpop.f32.mrf.mxu3 }
 0x169   : > { %v992_v19 = vmul.f32 0.35355338, %v989_v18 }
 0x16b   : > { %v996_v20 = vadd.f32 %v2647_v17, %v992_v19 }
 0x16d   : > { %v997_v21 = vsel %vm965_vm2, %v996_v20, -inf }
 0x16e   : > { %998 = vmax.xlane.f32.xlu0 %v997_v21 }
 0x1e1   : > { %v999_v33 = vpop.xlane.xlu0 %998 }
 0x1e2   : > { %v1000_v34 = vsub.f32 %v996_v20, %v999_v33 }
 0x1e4   : > { %v1001_v35 = vmul.f32 1.442695, %v1000_v34 }
 0x1e6   : > { %2236 = vpow2.f32 %v1001_v35 }
 0x1ec   : > { %v2237_v36 = vpop.eup %2236 }
 0x1ed   : > { %v1003_v37 = vsel %vm965_vm2, %v2237_v36, 0.0 }
 0x1ee   : > { %1004 = vadd.xlane.f32.xlu0 %v1003_v37  ;;  %v2099_v37 = vld [vmem:[%s2569_s22 + $0x50] sm:$0xff] }
 0x261   : > { %v1005_v48 = vpop.xlane.xlu0 %1004 }
 0x262   : > { %2238 = vrcp.f32 %v1005_v48 }
 0x268   : > { %v2239_v49 = vpop.eup %2238 }
 0x269   : > { %v1007_v50 = vmul.f32 %v2239_v49, %v1005_v48 }
 0x26b   : > { %v1008_v51 = vsub.f32 2.0, %v1007_v50  ;;  %v2116_v50 = vld [vmem:[%s2947_s8 + $0x70] sm:$0xff] }
 0x26d   : > { %v1009_v52 = vmul.f32 %v2239_v49, %v1008_v51  ;;  %v2115_v51 = vld [vmem:[%s2947_s8 + $0x68] sm:$0xff] }
 0x26f   : > { %v1010_v53 = vmul.f32 %v2237_v36, %v1009_v52  ;;  %v2100_v36 = vld [vmem:[%s2569_s22 + $0x58] sm:$0xff]  ;;  %v2114_v52 = vld [vmem:[%s2947_s8 + $0x60] sm:$0xff]  ;;  %s1777_s8 = sshll.u32 %s797_s4, 4  ;;  %s1778_s8 = int_to_ptr.vmem [resolvable:$true] %s1777_s8 }
 0x270   : > { %1320 = vmatpush.msra.mxu1 %v2100_v36 }
 0x271   : > { %2060 = vmatmul.msk.f32.vlgmr.msrb.gmra.mxu3 %vm965_vm2, %v1010_v53  ;;  %v2111_v53 = vld [vmem:[%s2548_s18 + $0x78] sm:$0xff] }
 0x272   : > { %1260 = vmatpush.msrb.mxu3 %v2088_v8  ;;  %1321 = vmatpush.msra.mxu1 %v2099_v37  ;;  %v2123_v8 = vld [vmem:[%s2569_s22 + $0x78] sm:$0xff] }
 0x274   : > { %1261 = vmatpush.msrb.mxu3 %v2087_v9  ;;  %1322 = vmatpush.msra.mxu1 %v2098_v38 }
 0x276   : > { %1262 = vmatpush.msrb.mxu3 %v2086_v11  ;;  %1323 = vmatpush.msra.mxu1 %v2097_v39 }
 0x278   : > { %1263 = vmatpush.msrb.mxu3 %v2085_v13 }
 0x279   : > { %2080 = vmatmul.msk.f32.vlgmr.msra.gmra.mxu3 %vm965_vm2, %v1063_v56  ;;  %v2109_v56 = vld [vmem:[%s2548_s18 + $0x68] sm:$0xff] }
 0x281   : > { %2090 = vmatmul.msk.f32.vlgmr.msrb.gmra.mxu3 %vm885_vm1, %v2627_v5 }
 0x2f4   : > { %v1031_v61 = vpop.f32.mrf.mxu3 }
 0x2f5   : > { %2084 = vmatmul.msk.f32.vlgmr.msra.gmra.mxu2 %vm965_vm2, %v1031_v61 }
 0x2fc   : > { %v1148_v62 = vpop.f32.mrf.mxu3 }
 0x2fd   : > { %v1151_v63 = vmul.f32 0.35355338, %v1148_v62 }
 0x2ff   : > { %v1152_v0 = vadd.f32 %v2647_v17, %v1151_v63 }
 0x301   : > { %v1153_v1 = vsel %vm965_vm2, %v1152_v0, -inf }
 0x302   : > { %1154 = vmax.xlane.f32.xlu1 %v1153_v1 }
 0x304   : > { %v1265_v27 = vpop.f32.mrf.mxu3 }
 0x305   : > { %v1266_v30 = vadd.f32 %v2224_v26, %v1265_v27  ;;  %v2129_v27 = vld [vmem:[%s2580_s21 + $0x18] sm:$0xff]  ;;  %s2961_s21 = sld [smem:[#allocation36_spill]] }
 0x375   : > { %v1155_v2 = vpop.xlane.xlu1 %1154 }
 0x376   : > { %v1156_v3 = vsub.f32 %v1152_v0, %v1155_v2  ;;  %v2226_v0 = vld [vmem:[%s2948_s12 + $0x3] ss:$0 sm:$0xff] }
 0x378   : > { %v1157_v4 = vmul.f32 1.442695, %v1156_v3  ;;  %v2706_v31 = vpop.f32.mrf.mxu2 }
 0x37a   : > { %2240 = vpow2.f32 %v1157_v4  ;;  %v2227_v4 = vld [vmem:[%s2949_s27 + $0x3] ss:$0 sm:$0xff] }
 0x380   : > { %v2241_v6 = vpop.eup %2240 }
 0x381   : > { %v1159_v7 = vsel %vm965_vm2, %v2241_v6, 0.0 }
 0x382   : > { %1160 = vadd.xlane.f32.xlu1 %v1159_v7 }
 0x3f5   : > { %v1161_v16 = vpop.xlane.xlu1 %1160 }
 0x3f6   : > { %2242 = vrcp.f32 %v1161_v16 }
 0x3fc   : > { %v2243_v18 = vpop.eup %2242 }
 0x3fd   : > { %v1163_v19 = vmul.f32 %v2243_v18, %v1161_v16  ;;  %v2122_v16 = vld [vmem:[%s2569_s22 + $0x70] sm:$0xff] }
 0x3ff   : > { %v1164_v20 = vsub.f32 2.0, %v1163_v19  ;;  %v2120_v19 = vld [vmem:[%s2569_s22 + $0x60] sm:$0xff] }
 0x401   : > { %v1165_v21 = vmul.f32 %v2243_v18, %v1164_v20  ;;  %v2121_v18 = vld [vmem:[%s2569_s22 + $0x68] sm:$0xff]  ;;  %s2953_s22 = scalar_lea.vmem %s2870_s9, %s2534_s17 }
 0x403   : > { %v1166_v22 = vmul.f32 %v2241_v6, %v1165_v21 }
 0x405   : > { %2081 = vmatmul.msk.f32.vlgmr.msrb.gmra.mxu0 %vm965_vm2, %v1166_v22 }
 0x406   : > { %1413 = vmatpush.msrb.mxu0 %v2106_v55 }
 0x40d   : > { %2096 = vmatmul.msk.f32.vlgmr.msra.gmra.mxu0 %vm885_vm1, %v2627_v5 }
 0x482   : > { %v1187_v24 = vpop.f32.mrf.mxu0 }
 0x483   : > { %2083 = vmatmul.msk.f32.vlgmr.msrb.gmra.mxu1 %vm965_vm2, %v1187_v24  ;;  %v2228_v24 = vld [vmem:[%s2574_s3 + $0x3] ss:$0 sm:$0xff] }
 0x484   : > { %1441 = vmatpush.msrb.mxu1 %v2111_v53 }
 0x486   : > { %1442 = vmatpush.msrb.mxu1 %v2110_v54 }
 0x488   : > { %1443 = vmatpush.msrb.mxu1 %v2109_v56 }
 0x48a   : > { %v1295_v28 = vpop.f32.mrf.mxu0  ;;  %1444 = vmatpush.msrb.mxu1 %v2108_v57 }
 0x48b   : > { %v1296_v29 = vadd.f32 %v2223_v25, %v1295_v28  ;;  %2102 = vmatmul.msk.f32.vlgmr.msra.gmra.mxu1 %vm885_vm1, %v2627_v5 }
 0x48d   : > { %2103 = vmatpush.xpose.msk.msrb.mxu2 %vm965_vm2, %v1296_v29 }
 0x490   : > { %2104 = vmatmul.msk.f32.vlgmr.msrb.gmra.mxu2 %vm965_vm2, %v1266_v30 }
 0x491   : > { %1471 = vmatpush.msra.mxu2 %v2117_v47 }
 0x493   : > { %1472 = vmatpush.msra.mxu2 %v2116_v50  ;;  %2113 = vmatmul.msk.f32.vlgmr.msrb.gmra.mxu1 %vm885_vm1, %v2627_v5  ;;  %v1649_v50 = vld [vmem:[%s2597_s6 + $0x8] sm:$0xff] }
 0x495   : > { %1473 = vmatpush.msra.mxu2 %v2115_v51 }
 0x497   : > { %1474 = vmatpush.msra.mxu2 %v2114_v52  ;;  %v1648_v52 = vld [vmem:[%s2597_s6] sm:$0xff] }
 0x498   : > { %2119 = vmatmul.msk.f32.vlgmr.msra.gmra.mxu2 %vm885_vm1, %v2627_v5 }
 0x499   : > { %1594 = vmatpush.msrb.mxu2 %v2129_v27 }
 0x500   : > { %v1212_v45 = vpop.f32.mrf.mxu1 }
 0x501   : > { %v1236_v9 = vadd.f32 %v2706_v31, %v1212_v45 }
 0x508   : > { %v1325_v48 = vpop.f32.mrf.mxu1 }
 0x509   : > { %v1326_v49 = vadd.f32 %v2225_v46, %v1325_v48 }
 0x50b   : > { %1388 = vmatpush.msra.mxu3 %v1326_v49  ;;  %v1651_v49 = vld [vmem:[%s2597_s6 + $0x18] sm:$0xff] }
 0x50d   : > { %1501 = vmatpush.msrb.mxu3 %v2123_v8  ;;  %v2231_v8 = vld [vmem:[%s2956_s23] ss:$0 sm:$0xff] }
 0x50f   : > { %1502 = vmatpush.msrb.mxu3 %v2122_v16  ;;  %v1690_v16 = vld [vmem:[%s2611_s20 + $0x10] sm:$0xff] }
 0x510   : > { %v1446_v6 = vpop.f32.mrf.mxu1 }
 0x511   : > { %v1447_v7 = vadd.f32 %v2227_v4, %v1446_v6  ;;  %1503 = vmatpush.msrb.mxu3 %v2121_v18  ;;  %v2230_v4 = vld [vmem:[%s2954_s0] ss:$0 sm:$0xff]  ;;  %v1689_v18 = vld [vmem:[%s2611_s20 + $0x8] sm:$0xff] }
 0x513   : > { %v1351_v32 = vpop.f32.mrf.mxu2  ;;  %1504 = vmatpush.msrb.mxu3 %v2120_v19  ;;  %v1688_v19 = vld [vmem:[%s2611_s20] sm:$0xff] }
 0x514   : > { %v1354_v33 = vmul.f32 0.35355338, %v1351_v32 }
 0x516   : > { %v1355_v34 = vadd.f32 %v2647_v17, %v1354_v33 }
 0x518   : > { %v1356_v35 = vsel %vm965_vm2, %v1355_v34, -inf }
 0x519   : > { %1357 = vmax.xlane.f32.xlu2 %v1356_v35  ;;  %v2229_v35 = vld [vmem:[%s2953_s22] ss:$0 sm:$0xff] }
 0x51b   : > { %v1476_v1 = vpop.f32.mrf.mxu2 }
 0x51c   : > { %v1477_v2 = vadd.f32 %v2226_v0, %v1476_v1 }
 0x51e   : > { %2126 = vmatpush.xpose.msk.msra.mxu0 %vm965_vm2, %v1477_v2 }
 0x58c   : > { %v1358_v40 = vpop.xlane.xlu2 %1357 }
 0x58d   : > { %v1359_v41 = vsub.f32 %v1355_v34, %v1358_v40 }
 0x58f   : > { %v1360_v42 = vmul.f32 1.442695, %v1359_v41 }
 0x591   : > { %2244 = vpow2.f32 %v1360_v42 }
 0x597   : > { %v2245_v43 = vpop.eup %2244 }
 0x598   : > { %v1362_v44 = vsel %vm965_vm2, %v2245_v43, 0.0 }
 0x599   : > { %1363 = vadd.xlane.f32.xlu2 %v1362_v44 }
 0x60c   : > { %v1364_v58 = vpop.xlane.xlu2 %1363 }
 0x60d   : > { %2246 = vrcp.f32 %v1364_v58 }
 0x613   : > { %v2247_v59 = vpop.eup %2246 }
 0x614   : > { %v1366_v60 = vmul.f32 %v2247_v59, %v1364_v58 }
 0x616   : > { %v1367_v61 = vsub.f32 2.0, %v1366_v60 }
 0x618   : > { %v1368_v62 = vmul.f32 %v2247_v59, %v1367_v61 }
 0x61a   : > { %v1369_v63 = vmul.f32 %v2245_v43, %v1368_v62  ;;  %v2356_v43 = vmov 32.0  }
 0x61c   : > { %2105 = vmatmul.msk.f32.vlgmr.msra.gmra.mxu3 %vm965_vm2, %v1369_v63 }
 0x61d   : > { %1671 = vmatpush.msra.mxu3 %v1651_v49 }
 0x624   : > { %2125 = vmatmul.msk.f32.vlgmr.msrb.gmra.mxu3 %vm885_vm1, %v2627_v5 }
 0x69f   : > { %v1390_v3 = vpop.f32.mrf.mxu3 }
 0x6a0   : > { %2107 = vmatmul.msk.f32.vlgmr.msrb.gmra.mxu0 %vm965_vm2, %v1390_v3 }
 0x6a7   : > { %v1506_v25 = vpop.f32.mrf.mxu3 }
 0x6a8   : > { %2127 = vmatmul.msk.f32.vlgmr.msra.gmra.mxu0 %vm965_vm2, %v1447_v7  ;;  %v1507_v26 = vadd.f32 %v2228_v24, %v1506_v25 }
 0x6aa   : > { %1569 = vmatpush.msra.mxu1 %v1507_v26 }
 0x71d   : > { %v1415_v10 = vpop.f32.mrf.mxu0 }
 0x71e   : > { %v1418_v11 = vadd.f32 %v1415_v10, %v1236_v9 }
 0x725   : > { %v1532_v12 = vpop.f32.mrf.mxu0 }
 0x726   : > { %v1535_v13 = vmul.f32 0.35355338, %v1532_v12  ;;  %v1694_v12 = vld [vmem:[%s2611_s20 + $0x30] sm:$0xff] }
 0x728   : > { %v1536_v14 = vadd.f32 %v2647_v17, %v1535_v13  ;;  %v1693_v13 = vld [vmem:[%s2611_s20 + $0x28] sm:$0xff] }
 0x72a   : > { %v1537_v15 = vsel %vm965_vm2, %v1536_v14, -inf }
 0x72b   : > { %1538 = vmax.xlane.f32.xlu0 %v1537_v15  ;;  %v1691_v15 = vld [vmem:[%s2611_s20 + $0x18] sm:$0xff] }
 0x79e   : > { %v1539_v20 = vpop.xlane.xlu0 %1538 }
 0x79f   : > { %v1540_v21 = vsub.f32 %v1536_v14, %v1539_v20  ;;  %v1692_v14 = vld [vmem:[%s2611_s20 + $0x20] sm:$0xff] }
 0x7a0   : > { %v2232_v20 = vld [vmem:[%s853_s7] ss:$0 sm:$0xff]  ;;  %s2957_s7 = sld [smem:[#allocation9_spill]] }
 0x7a1   : > { %v1541_v22 = vmul.f32 1.442695, %v1540_v21 }
 0x7a3   : > { %2248 = vpow2.f32 %v1541_v22 }
 0x7a9   : > { %v2249_v23 = vpop.eup %2248 }
 0x7aa   : > { %v1543_v17 = vsel %vm965_vm2, %v2249_v23, 0.0 }
 0x7ab   : > { %1544 = vadd.xlane.f32.xlu1 %v1543_v17 }
 0x81e   : > { %v1545_v28 = vpop.xlane.xlu1 %1544 }
 0x81f   : > { %2250 = vrcp.f32 %v1545_v28 }
 0x820   : > { %2252 = vrcp.f32 %v2356_v43 }
 0x825   : > { %v2251_v29 = vpop.eup %2250 }
 0x826   : > { %v1547_v30 = vmul.f32 %v2251_v29, %v1545_v28  ;;  %v2253_v44 = vpop.eup %2252 }
 0x827   : > { %v1612_v45 = vmul.f32 32.0, %v2253_v44  ;;  %vm1616_vm3 = vweird.f32 %v2253_v44 }
 0x828   : > { %v1548_v31 = vsub.f32 2.0, %v1547_v30 }
 0x829   : > { %v1613_v46 = vsub.f32 1.0, %v1612_v45 }
 0x82a   : > { %v1549_v32 = vmul.f32 %v2251_v29, %v1548_v31  ;;  %v2233_v31 = vld [vmem:[%s861_s5] ss:$0 sm:$0xff]  ;;  %s2134_s5 = sshll.u32 %s2957_s7, 1 }
 0x82b   : > { %v1614_v47 = vmul.f32 %v2253_v44, %v1613_v46  ;;  %s1773_s2 = sadd.s32 %s2958_s16, %s2134_s5  ;;  %s2280_s16 = scalar_lea.hbm %s2961_s21, 32 }
 0x82c   : > { %v1550_v33 = vmul.f32 %v2249_v23, %v1549_v32  ;;  %s2135_s26 = sshll.u32 %s1773_s2, 3 }
 0x82d   : > { %v1615_v48 = vadd.f32 %v2253_v44, %v1614_v47  ;;  %s1775_s0 = scalar_lea.hbm %s2961_s21, %s2135_s26 }
 0x82e   : > { %2128 = vmatmul.msk.f32.vlgmr.msra.gmra.mxu1 %vm965_vm2, %v1550_v33  ;;  %s1779_s12 = sshll.u32 %s1775_s0, 4  ;;  %s1780_s12 = int_to_ptr.hbm [resolvable:$true] %s1779_s12 }
 0x82f   : > { %v2762_v51 = vsel %vm1616_vm3, %v2253_v44, %v1615_v48  ;;  %s2274_s27 = sshra.s32 %s1780_s12, 4  ;;  %s2275_s27 = int_to_ptr.hbm [resolvable:$true] %s2274_s27 }
 0x830   : > { %s2276_s7 = scalar_lea.hbm %s2275_s27, 8  ;;  %p2281_p5 = scmp.lt.s32.totalorder %s2275_s27, %s2961_s21 }
 0x831   : > { %p2277_p1 = scmp.ne.s32.totalorder %s2275_s27, %s2276_s7  ;;  %p2282_p6 = scmp.lt.s32.totalorder %s2280_s16, %s2276_s7 }
 0x833   : > { %p2278_p2 = pnand %p2277_p1, %p2503_p3  ;;  %p2283_p7 = por %p2282_p6, %p2281_p5 }
 0x835   : > { %p2279_p4 = pneg %p2278_p2 }
 0x837   : > { %p2284_p9 = pnand %p2283_p7, %p2279_p4 }
 0x8ab   : > { %v1571_v34 = vpop.f32.mrf.mxu1 }
 0x8ac   : > { %2130 = vmatmul.msk.f32.vlgmr.msrb.gmra.mxu2 %vm965_vm2, %v1571_v34 }
 0x92f   : > { %v1596_v36 = vpop.f32.mrf.mxu2 }
 0x930   : > { %v1599_v37 = vadd.f32 %v1596_v36, %v1418_v11  ;;  %v1695_v11 = vld [vmem:[%s2611_s20 + $0x38] sm:$0xff] }
 0x931   : > { %1712 = vmatpush.msrb.mxu0 %v1695_v11 }
 0x932   : > { %v1604_v38 = vadd.f32 %v2229_v35, %v1599_v37 }
 0x933   : > { %1713 = vmatpush.msrb.mxu0 %v1694_v12 }
 0x934   : > { %v1605_v39 = vadd.f32 %v1604_v38, %v2627_v5  ;;  %v1650_v5 = vld [vmem:[%s2597_s6 + $0x10] sm:$0xff] }
 0x935   : > { %1672 = vmatpush.msra.mxu3 %v1650_v5  ;;  %1714 = vmatpush.msrb.mxu0 %v1693_v13 }
 0x936   : > { %v1608_v40 = vsel %vm885_vm1, %v1605_v39, 0.0  ;;  %v1619_v41 = vmul.f32 %v1605_v39, %v1605_v39 }
 0x937   : > { %1609 = vadd.xlane.f32.xlu2 %v1608_v40  ;;  %1673 = vmatpush.msra.mxu3 %v1649_v50 }
 0x938   : > { %v1620_v42 = vsel %vm885_vm1, %v1619_v41, 0.0  ;;  %1715 = vmatpush.msrb.mxu0 %v1692_v14 }
 0x939   : > { %1621 = vadd.xlane.f32.xlu0 %v1620_v42  ;;  %1674 = vmatpush.msra.mxu3 %v1648_v52  ;;  %v2234_v52 = vld [vmem:[%s864_s24] ss:$0 sm:$0xff]  ;;  %s2964_s24 = sand.u32 1, %s2959_s29  }
 0x93a   : > { %1716 = vmatpush.msrb.mxu0 %v1691_v15  ;;  %s1763_s20 = scalar_lea.sflag [#allocation4], %s2964_s24 }
 0x93c   : > { %1717 = vmatpush.msrb.mxu0 %v1690_v16 }
 0x93e   : > { %1718 = vmatpush.msrb.mxu0 %v1689_v18 }
 0x940   : > { %1719 = vmatpush.msrb.mxu0 %v1688_v19 }
 0x9aa   : > { %v1610_v53 = vpop.xlane.xlu2 %1609 }
 0x9ab   : > { %v1618_v54 = vmul.f32 %v2762_v51, %v1610_v53 }
 0x9ac   : > { %v1622_v55 = vpop.xlane.xlu0 %1621 }
 0x9ad   : > { %v1624_v56 = vmul.f32 %v1618_v54, %v1618_v54  ;;  %v1623_v57 = vmul.f32 %v1622_v55, %v2762_v51  ;;  %v1627_v3 = vsub.f32 %v1605_v39, %v1618_v54  ;;  %v2235_v55 = vld [vmem:[%s867_s11] ss:$0 sm:$0xff] }
 0x9af   : > { %v1625_v58 = vsub.f32 %v1623_v57, %v1624_v56 }
 0x9b1   : > { %v1626_v59 = vmax.f32 %v1625_v58, 0.0 }
 0x9b3   : > { %v1628_v60 = vadd.f32 1e-12, %v1626_v59 }
 0x9b5   : > { %2254 = vrsqrt.f32 %v1628_v60  ;;  %vm1635_vm5 = vweird.f32 %v1628_v60 }
 0x9bb   : > { %v2255_v61 = vpop.eup %2254 }
 0x9bc   : > { %v1630_v62 = vmul.f32 %v2255_v61, %v1628_v60  ;;  %vm1636_vm4 = vweird.f32 %v2255_v61 }
 0x9bd   : > { %vm1637_vm6 = vmor %vm1635_vm5, %vm1636_vm4 }
 0x9be   : > { %v1631_v63 = vmul.f32 %v2255_v61, %v1630_v62 }
 0x9c0   : > { %v1632_v0 = vmul.f32 0.5, %v1631_v63 }
 0x9c2   : > { %v1633_v1 = vsub.f32 1.5, %v1632_v0 }
 0x9c4   : > { %v1634_v2 = vmul.f32 %v2255_v61, %v1633_v1 }
 0x9c6   : > { %v1638_v6 = vsel %vm1637_vm6, %v2255_v61, %v1634_v2 }
 0x9c7   : > { %v1639_v7 = vmul.f32 %v1638_v6, %v1627_v3 }
 0x9c9   : > { %v1643_v9 = vmul.f32 %v2230_v4, %v1639_v7 }
 0x9cb   : > { %v1647_v10 = vadd.f32 %v2231_v8, %v1643_v9 }
 0x9cd   : > { %2131 = vmatmul.msk.f32.vlgmr.msra.gmra.mxu3 %vm885_vm1, %v1647_v10 }
 0xa50   : > { %v1676_v21 = vpop.f32.mrf.mxu3 }
 0xa51   : > { %v1677_v22 = vadd.f32 %v2232_v20, %v1676_v21 }
 0xa53   : > { %v1680_v23 = vmul.f32 0.044715, %v1677_v22  ;;  %v1679_v28 = vmul.f32 0.5, %v1677_v22 }
 0xa55   : > { %v1681_v17 = vmul.f32 %v1680_v23, %v1677_v22 }
 0xa57   : > { %v1682_v24 = vmul.f32 %v1681_v17, %v1677_v22 }
 0xa59   : > { %v1683_v25 = vadd.f32 %v1682_v24, %v1677_v22 }
 0xa5b   : > { %v1684_v26 = vmul.f32 0.7978846, %v1683_v25 }
 0xa5d   : > { %2256 = vtanh.f32 %v1684_v26 }
 0xa63   : > { %v2257_v27 = vpop.eup %2256 }
 0xa64   : > { %v1686_v29 = vadd.f32 1.0, %v2257_v27 }
 0xa66   : > { %v1687_v30 = vmul.f32 %v1686_v29, %v1679_v28 }
 0xa68   : > { %2132 = vmatmul.msk.f32.vlgmr.msrb.gmra.mxu0 %vm1700_vm7, %v1687_v30 }
 0xae5   : > { %v1721_v32 = vpop.f32.mrf.mxu0 }
 0xae6   : > { %v1722_v33 = vadd.f32 %v2233_v31, %v1721_v32 }
 0xae8   : > { %v1724_v34 = vadd.f32 %v1722_v33, %v1647_v10 }
 0xaea   : > { %v1727_v35 = vsel %vm885_vm1, %v1724_v34, 0.0  ;;  %v1731_v36 = vmul.f32 %v1724_v34, %v1724_v34 }
 0xaeb   : > { %1728 = vadd.xlane.f32.xlu1 %v1727_v35 }
 0xaec   : > { %v1732_v37 = vsel %vm885_vm1, %v1731_v36, 0.0 }
 0xaed   : > { %1733 = vadd.xlane.f32.xlu2 %v1732_v37 }
 0xb5e   : > { %v1729_v38 = vpop.xlane.xlu1 %1728 }
 0xb5f   : > { %v1730_v39 = vmul.f32 %v1729_v38, %v2762_v51 }
 0xb60   : > { %v1734_v40 = vpop.xlane.xlu2 %1733 }
 0xb61   : > { %v1736_v41 = vmul.f32 %v1730_v39, %v1730_v39  ;;  %v1735_v42 = vmul.f32 %v1734_v40, %v2762_v51  ;;  %v1739_v51 = vsub.f32 %v1724_v34, %v1730_v39 }
 0xb63   : > { %v1737_v43 = vsub.f32 %v1735_v42, %v1736_v41 }
 0xb65   : > { %v1738_v44 = vmax.f32 %v1737_v43, 0.0 }
 0xb67   : > { %v1740_v45 = vadd.f32 1e-12, %v1738_v44 }
 0xb69   : > { %2258 = vrsqrt.f32 %v1740_v45  ;;  %vm1747_vm9 = vweird.f32 %v1740_v45 }
 0xb6f   : > { %v2259_v46 = vpop.eup %2258 }
 0xb70   : > { %v1742_v47 = vmul.f32 %v2259_v46, %v1740_v45  ;;  %vm1748_vm8 = vweird.f32 %v2259_v46 }
 0xb71   : > { %vm1749_vm10 = vmor %vm1747_vm9, %vm1748_vm8 }
 0xb72   : > { %v1743_v48 = vmul.f32 %v2259_v46, %v1742_v47 }
 0xb74   : > { %v1744_v49 = vmul.f32 0.5, %v1743_v48 }
 0xb76   : > { %v1745_v5 = vsub.f32 1.5, %v1744_v49 }
 0xb78   : > { %v1746_v50 = vmul.f32 %v2259_v46, %v1745_v5 }
 0xb7a   : > { %v1750_v53 = vsel %vm1749_vm10, %v2259_v46, %v1746_v50 }
 0xb7b   : > { %v1751_v54 = vmul.f32 %v1750_v53, %v1739_v51 }
 0xb7d   : > { %v1755_v56 = vmul.f32 %v2234_v52, %v1751_v54 }
 0xb7f   : > { %v1759_v57 = vadd.f32 %v2235_v55, %v1755_v56 }
 0xb81   : > { %1760 = vst.msk [vmem:[#allocation2] sm:$0xff] %vm885_vm1, %v1759_v57 }
 0xb82   : > { %1761 = vst.msk [vmem:[%s797_s4] sm:$0xff] %vm885_vm1, %v1759_v57 }
 0xb83   : > { %2287 = shalt.err (!%p2284_p9)
}
 0xb84   : > { %2144 = dma.vmem_to_hbm [thread:$0]  (%p2503_p3), %s1778_s8, 128, %s1780_s12, %s1763_s20  }
 0xb85 PF: > { %s2965_s19 = sld [smem:[#allocation13_spill]] }
 0xb86   : > { %s2966_s4 = sld [smem:[#allocation6_spill]] }
 0xb8b   : > { %p2150_p10 = scmp.ge.s32.totalorder %s2965_s19, 2 }
 0xb8c   : > { %s1791_s29 = sand.u32 1, %s2966_s4  }
 0xb8d   : > { %p2147_p11 = pnand %p2150_p10, %p2512_p8  ;;  %s1792_s28 = scalar_lea.sflag [#allocation4], %s1791_s29 }
 0xb8f   : > { %p2148_p12 = pneg %p2147_p11 }
 0xb91   : > { %2321 = dma.done.wait (%p2148_p12), %s1792_s28, 128  }
 0xb92   : > { %2323 = vsyncadd (%p2148_p12), %s1792_s28, 4294967168  ;;  %s31_s20 = sadd.s32 1, %s2965_s19   ;;  %s2968_s27 = sld [smem:[#allocation7_spill]] }
 0xb93   : > { %p28_p13 = scmp.ge.s32.totalorder %s31_s20, 6   ;;  %s2969_s28 = sld [smem:[#allocation8_spill]] }
 0xb94   : > { %s2970_s29 = sld [smem:[#allocation18_spill]] }
 0xb95   : > { %s2971_s30 = sld [smem:[#allocation11_spill]]  ;;  %30 = sbr.rel (!%p28_p13) target bundleno = 20 (0x14), region = 203 }
 0xb96   : > { %s2972_s0 = sld [smem:[#allocation12_spill]] }
 0xb97   : > { %s2973_s19 = sld [smem:[#allocation14_spill]] }
 0xb98   : > { %s2974_s1 = sld [smem:[#allocation16_spill]] }
 0xb9a   :  { %1798 = vsyncpa [#allocation4], 1 }
 0xb9b   :  { %1800 = vsyncpa [#allocation4 + $0x1], 1 }

</bundles_post_ra>
